<compile_context>
chip_gen: v5e
topology: v5e:2x2
jax: 0.10.0
libtpu: 0.0.40
codegen_flags: <defaults>
</compile_context>

<pallas_src>
import functools
import math

import jax
import jax.numpy as jnp
from jax.experimental import pallas as pl
from jax.experimental.pallas import tpu as pltpu


_SCAL_W = 128  # lane-dense width of the packed scalar output row


def _sigmoid(x):
    return 1.0 / (1.0 + jnp.exp(-x))


# ----------------------------------------------------------------------------
# The single fused Pallas kernel (one grid step per batch row)
# ----------------------------------------------------------------------------

def fused_arg_kernel(
        # per-batch-row data
        content_emb_ref, ftr_emb_ref, cmask_ref, f2mask_ref, f3mask_ref,
        # BERT-stub encoder weights (stacked: [content, ftr])
        enc_w_ref, enc_b_ref,
        # packed cross-attention projections
        wpc_ref, bpc_ref, wpf2_ref, bpf2_ref, wpf3_ref, bpf3_ref,
        wo_ref, bo_ref,
        # MaskAttention weights (rows: content_att, simple_att_2, simple_att_3, aggregator)
        att_w_ref, att_b_ref,
        # mlp2-style heads (hard2, hard3, simple2, simple3, final_mlp); out dim padded to 4
        hA_w1_ref, hA_b1_ref, hA_w2_ref, hA_b2_ref,
        # score mappers (ftr_2, ftr_3)
        mp_w1_ref, mp_b1_ref, mp_w2_ref, mp_b2_ref, mp_w3_ref, mp_b3_ref,
        # outputs
        feats_ref, scal_ref,
        *, D, Lf, scal_width):
    f32 = jnp.float32
    content_emb = content_emb_ref[0]          # (Lc, D)
    ftr_emb = ftr_emb_ref[0]                  # (2*Lf, D): [ftr2 ; ftr3]
    cmask = cmask_ref[0]                      # (1, Lc)
    f2mask = f2mask_ref[0]                    # (1, Lf)
    f3mask = f3mask_ref[0]                    # (1, Lf)

    # ---- BERT-stub encoders: tanh(x @ W + b).
    # TODO(synk): pretrained 12-layer BertModel is not reproduced; this is a
    # deterministic embedding + tanh(linear) stand-in.
    content_feat = jnp.tanh(
        jnp.dot(content_emb, enc_w_ref[0], preferred_element_type=f32) + enc_b_ref[0])
    ftr_feat = jnp.tanh(
        jnp.dot(ftr_emb, enc_w_ref[1], preferred_element_type=f32) + enc_b_ref[1])
    ftr2_feat = ftr_feat[:Lf]                 # (Lf, D)
    ftr3_feat = ftr_feat[Lf:]                 # (Lf, D)

    # ---- Packed q/k/v projections for the four single-head cross attentions.
    cproj = jnp.dot(content_feat, wpc_ref[...], preferred_element_type=f32) + bpc_ref[...]   # (Lc, 6D)
    f2proj = jnp.dot(ftr2_feat, wpf2_ref[...], preferred_element_type=f32) + bpf2_ref[...]   # (Lf, 3D)
    f3proj = jnp.dot(ftr3_feat, wpf3_ref[...], preferred_element_type=f32) + bpf3_ref[...]   # (Lf, 3D)
    k_c2, v_c2 = cproj[:, 0 * D:1 * D], cproj[:, 1 * D:2 * D]
    k_c3, v_c3 = cproj[:, 2 * D:3 * D], cproj[:, 3 * D:4 * D]
    q_f2, q_f3 = cproj[:, 4 * D:5 * D], cproj[:, 5 * D:6 * D]
    q_c2, k_f2, v_f2 = f2proj[:, 0 * D:1 * D], f2proj[:, 1 * D:2 * D], f2proj[:, 2 * D:3 * D]
    q_c3, k_f3, v_f3 = f3proj[:, 0 * D:1 * D], f3proj[:, 1 * D:2 * D], f3proj[:, 2 * D:3 * D]

    inv_sqrt_d = f32(1.0 / math.sqrt(D))

    def attn_ctx_mean(q, k, v, mask_row):
        # scores (Lq, Lk); -1e9 fill matches MultiHeadedAttention; softmax over keys.
        s = jax.lax.dot_general(q, k, (((1,), (1,)), ((), ())),
                                preferred_element_type=f32) * inv_sqrt_d
        s = jnp.where(mask_row == 0.0, f32(-1e9), s)
        m = jnp.max(s, axis=-1, keepdims=True)
        e = jnp.exp(s - m)
        p = e / jnp.sum(e, axis=-1, keepdims=True)
        # dropout(p): eval mode -> identity.
        # seq-mean folded before the PV matmul: mean_q(p @ v) == mean_q(p) @ v.
        p_bar = jnp.mean(p, axis=0, keepdims=True)             # (1, Lk)
        return jnp.dot(p_bar, v, preferred_element_type=f32)   # (1, D)

    ctx_c2 = attn_ctx_mean(q_c2, k_c2, v_c2, cmask)   # query = ftr2, kv = content
    ctx_c3 = attn_ctx_mean(q_c3, k_c3, v_c3, cmask)   # query = ftr3, kv = content
    ctx_f2 = attn_ctx_mean(q_f2, k_f2, v_f2, f2mask)  # query = content, kv = ftr2
    ctx_f3 = attn_ctx_mean(q_f3, k_f3, v_f3, f3mask)  # query = content, kv = ftr3

    # All 4 output projections as one lane-dense block-diagonal matmul (1, 4D).
    ctx_cat = jnp.concatenate([ctx_c2, ctx_c3, ctx_f2, ctx_f3], axis=-1)
    branch = jnp.dot(ctx_cat, wo_ref[...], preferred_element_type=f32) + bo_ref[...]
    expert_2 = branch[:, 0 * D:1 * D]
    expert_3 = branch[:, 1 * D:2 * D]
    mutual_f2 = branch[:, 2 * D:3 * D]
    mutual_f3 = branch[:, 3 * D:4 * D]

    def mask_attention(x, row_idx, mask_row):
        # Score in lane-major (1, L) layout; weighted sum on the MXU.
        w_row = att_w_ref[row_idx:row_idx + 1, :]               # (1, D)
        b = att_b_ref[0:1, row_idx:row_idx + 1]                 # (1, 1)
        s = jax.lax.dot_general(w_row, x, (((1,), (1,)), ((), ())),
                                preferred_element_type=f32) + b  # (1, L)
        if mask_row is not None:
            # Large finite fill (robust to fully-masked rows; -inf would NaN).
            s = jnp.where(mask_row == 0.0, f32(-1e9), s)
        m = jnp.max(s, axis=-1, keepdims=True)
        e = jnp.exp(s - m)
        p = e / jnp.sum(e, axis=-1, keepdims=True)              # (1, L)
        return jnp.dot(p, x, preferred_element_type=f32)        # (1, D)

    attn_content = mask_attention(content_feat, 0, cmask)
    satt2 = mask_attention(ftr2_feat, 1, None)
    satt3 = mask_attention(ftr3_feat, 2, None)

    def mlp2_head(x, i, out_dim, sigmoid):
        # Linear -> (BatchNorm1d eval: identity) -> ReLU -> (Dropout: identity)
        # -> Linear (output dim padded to 4 in the stacked weights) -> [Sigmoid]
        h = jnp.maximum(
            jnp.dot(x, hA_w1_ref[i], preferred_element_type=f32) + hA_b1_ref[i], 0.0)
        o = jnp.dot(h, hA_w2_ref[i], preferred_element_type=f32) + hA_b2_ref[i]
        o = o[:, :out_dim]
        return _sigmoid(o) if sigmoid else o

    def mapper_head(x, i):
        # Linear -> BN(id) -> ReLU -> Dropout(id) -> Linear -> BN(id) -> ReLU
        # -> Dropout(id) -> Linear -> Sigmoid
        h1 = jnp.maximum(
            jnp.dot(x, mp_w1_ref[i], preferred_element_type=f32) + mp_b1_ref[i], 0.0)
        h2 = jnp.maximum(
            jnp.dot(h1, mp_w2_ref[i], preferred_element_type=f32) + mp_b2_ref[i], 0.0)
        o = jnp.dot(h2, mp_w3_ref[i], preferred_element_type=f32) + mp_b3_ref[i]
        return _sigmoid(o)                                      # (1, 1)

    hard2 = mlp2_head(mutual_f2, 0, 1, True)                    # (1, 1)
    hard3 = mlp2_head(mutual_f3, 1, 1, True)
    simple2 = mlp2_head(satt2, 2, 3, False)                     # (1, 3)
    simple3 = mlp2_head(satt3, 3, 3, False)

    score2 = mapper_head(mutual_f2, 0)                          # (1, 1)
    score3 = mapper_head(mutual_f3, 1)

    rw2 = score2 * expert_2                                     # (1, D)
    rw3 = score3 * expert_3

    all_feature = jnp.concatenate([attn_content, rw2, rw3], axis=0)   # (3, D)
    final_feature = mask_attention(all_feature, 3, None)              # (1, D)

    classify = mlp2_head(final_feature, 4, 1, True)                   # (1, 1)

    # ---- lane-dense packed outputs.
    feats = jnp.concatenate([final_feature, attn_content, rw2, rw3], axis=-1)  # (1, 4D)
    feats_ref[...] = feats[None]

    scal = jnp.concatenate(
        [classify, hard2, hard3, score2, score3, simple2, simple3], axis=-1)   # (1, 11)
    pad = scal_width - scal.shape[-1]
    scal_ref[...] = jnp.concatenate([scal, jnp.zeros((1, pad), f32)], axis=-1)[None]


# ----------------------------------------------------------------------------
# Wrapper: weight packing (glue), BlockSpecs, grid, output unpacking
# ----------------------------------------------------------------------------

def _block_diag(ws):
    d = ws[0].shape[0]
    n = len(ws)
    out = jnp.zeros((n * d, n * d), jnp.float32)
    for i, w in enumerate(ws):
        out = out.at[i * d:(i + 1) * d, i * d:(i + 1) * d].set(w)
    return out


def _pack_weights(params):
    enc_w = jnp.stack([params["bert_content"]["w"], params["bert_ftr"]["w"]])   # (2, D, D)
    enc_b = jnp.stack([params["bert_content"]["b"], params["bert_ftr"]["b"]])   # (2, 1, D)

    c2, c3 = params["xattn_c2"], params["xattn_c3"]
    f2, f3 = params["xattn_f2"], params["xattn_f3"]
    # each is (wq, bq, wk, bk, wv, bv, wo, bo)
    wpc = jnp.concatenate([c2[2], c2[4], c3[2], c3[4], f2[0], f3[0]], axis=1)   # (D, 6D)
    bpc = jnp.concatenate([c2[3], c2[5], c3[3], c3[5], f2[1], f3[1]], axis=1)   # (1, 6D)
    wpf2 = jnp.concatenate([c2[0], f2[2], f2[4]], axis=1)                       # (D, 3D)
    bpf2 = jnp.concatenate([c2[1], f2[3], f2[5]], axis=1)
    wpf3 = jnp.concatenate([c3[0], f3[2], f3[4]], axis=1)
    bpf3 = jnp.concatenate([c3[1], f3[3], f3[5]], axis=1)
    wo_blk = _block_diag([c2[6], c3[6], f2[6], f3[6]])                          # (4D, 4D)
    bo_cat = jnp.concatenate([c2[7], c3[7], f2[7], f3[7]], axis=1)              # (1, 4D)

    att = [params["content_att"], params["simple_att_2"],
           params["simple_att_3"], params["aggregator"]]
    att_w = jnp.concatenate([w.T for (w, _) in att], axis=0)                    # (4, D)
    att_b = jnp.concatenate([b for (_, b) in att], axis=1)                      # (1, 4)

    heads = [params["hard_mlp_2"], params["hard_mlp_3"],
             params["simple_mlp_2"], params["simple_mlp_3"], params["mlp"]]
    hA_w1 = jnp.stack([h[0] for h in heads])                                    # (5, D, M)
    hA_b1 = jnp.stack([h[1] for h in heads])                                    # (5, 1, M)
    hA_w2 = jnp.stack([jnp.pad(h[2], ((0, 0), (0, 4 - h[2].shape[1]))) for h in heads])  # (5, M, 4)
    hA_b2 = jnp.stack([jnp.pad(h[3], ((0, 0), (0, 4 - h[3].shape[1]))) for h in heads])  # (5, 1, 4)

    maps = [params["score_mapper_2"], params["score_mapper_3"]]
    mp_w1 = jnp.stack([m[0] for m in maps])                                     # (2, D, M)
    mp_b1 = jnp.stack([m[1] for m in maps])
    mp_w2 = jnp.stack([m[2] for m in maps])                                     # (2, M, 64)
    mp_b2 = jnp.stack([m[3] for m in maps])
    mp_w3 = jnp.stack([m[4] for m in maps])                                     # (2, 64, 1)
    mp_b3 = jnp.stack([m[5] for m in maps])

    return (enc_w, enc_b, wpc, bpc, wpf2, bpf2, wpf3, bpf3, wo_blk, bo_cat,
            att_w, att_b, hA_w1, hA_b1, hA_w2, hA_b2,
            mp_w1, mp_b1, mp_w2, mp_b2, mp_w3, mp_b3)


@jax.jit
def arg_forward(params, content, content_masks, ftr2, ftr2_masks, ftr3, ftr3_masks):
    B, Lc = content.shape
    _, Lf = ftr2.shape
    D = params["bert_content"]["w"].shape[0]
    M = params["mlp"][0].shape[1]

    # Embedding lookup is a data-dependent gather: kept in plain JAX (glue).
    content_emb = params["bert_content"]["emb"][content]                        # (B, Lc, D)
    ftr_emb = jnp.concatenate(
        [params["bert_ftr"]["emb"][ftr2], params["bert_ftr"]["emb"][ftr3]], axis=1)  # (B, 2Lf, D)

    cmask3 = content_masks.reshape(B, 1, Lc).astype(jnp.float32)
    f2mask3 = ftr2_masks.reshape(B, 1, Lf).astype(jnp.float32)
    f3mask3 = ftr3_masks.reshape(B, 1, Lf).astype(jnp.float32)

    (enc_w, enc_b, wpc, bpc, wpf2, bpf2, wpf3, bpf3, wo_blk, bo_cat,
     att_w, att_b, hA_w1, hA_b1, hA_w2, hA_b2,
     mp_w1, mp_b1, mp_w2, mp_b2, mp_w3, mp_b3) = _pack_weights(params)

    def row3(b):
        return (b, 0, 0)

    def const2(b):
        return (0, 0)

    def const3(b):
        return (0, 0, 0)

    in_specs = [
        pl.BlockSpec((1, Lc, D), row3),
        pl.BlockSpec((1, 2 * Lf, D), row3),
        pl.BlockSpec((1, 1, Lc), row3),
        pl.BlockSpec((1, 1, Lf), row3),
        pl.BlockSpec((1, 1, Lf), row3),
        pl.BlockSpec((2, D, D), const3),
        pl.BlockSpec((2, 1, D), const3),
        pl.BlockSpec((D, 6 * D), const2),
        pl.BlockSpec((1, 6 * D), const2),
        pl.BlockSpec((D, 3 * D), const2),
        pl.BlockSpec((1, 3 * D), const2),
        pl.BlockSpec((D, 3 * D), const2),
        pl.BlockSpec((1, 3 * D), const2),
        pl.BlockSpec((4 * D, 4 * D), const2),
        pl.BlockSpec((1, 4 * D), const2),
        pl.BlockSpec((4, D), const2),
        pl.BlockSpec((1, 4), const2),
        pl.BlockSpec((5, D, M), const3),
        pl.BlockSpec((5, 1, M), const3),
        pl.BlockSpec((5, M, 4), const3),
        pl.BlockSpec((5, 1, 4), const3),
        pl.BlockSpec((2, D, M), const3),
        pl.BlockSpec((2, 1, M), const3),
        pl.BlockSpec((2, M, 64), const3),
        pl.BlockSpec((2, 1, 64), const3),
        pl.BlockSpec((2, 64, 1), const3),
        pl.BlockSpec((2, 1, 1), const3),
    ]
    out_specs = [
        pl.BlockSpec((1, 1, 4 * D), row3),
        pl.BlockSpec((1, 1, _SCAL_W), row3),
    ]
    out_shape = [
        jax.ShapeDtypeStruct((B, 1, 4 * D), jnp.float32),
        jax.ShapeDtypeStruct((B, 1, _SCAL_W), jnp.float32),
    ]

    kern = functools.partial(fused_arg_kernel, D=D, Lf=Lf, scal_width=_SCAL_W)
    feats_out, scal_out = pl.pallas_call(
        kern,
        out_shape=out_shape,
        grid=(B,),
        in_specs=in_specs,
        out_specs=out_specs,
        compiler_params=pltpu.CompilerParams(dimension_semantics=("parallel",)),
    )(content_emb, ftr_emb, cmask3, f2mask3, f3mask3,
      enc_w, enc_b, wpc, bpc, wpf2, bpf2, wpf3, bpf3, wo_blk, bo_cat,
      att_w, att_b, hA_w1, hA_b1, hA_w2, hA_b2,
      mp_w1, mp_b1, mp_w2, mp_b2, mp_w3, mp_b3)

    feats = feats_out[:, 0, :]                 # (B, 4D)
    scal = scal_out[:, 0, :]                   # (B, 128)
    final_feature = feats[:, 0:D]
    attn_content = feats[:, D:2 * D]
    rw2 = feats[:, 2 * D:3 * D]
    rw3 = feats[:, 3 * D:4 * D]

    return {
        "classify_pred": scal[:, 0],
        "gate_value": scal[:, 3:5],
        "final_feature": final_feature,
        "content_feature": attn_content,
        "ftr_2_feature": rw2,
        "ftr_3_feature": rw3,
        "hard_ftr_2_pred": scal[:, 1],
        "hard_ftr_3_pred": scal[:, 2],
        "simple_ftr_2_pred": scal[:, 5:8],
        "simple_ftr_3_pred": scal[:, 8:11],
    }


# ----------------------------------------------------------------------------
# Parameter initialization (deterministic, synthetic)
# ----------------------------------------------------------------------------

def init_params(key, vocab, D, M):
    keys = iter(jax.random.split(key, 128))

    def nrm(shape, scale=0.05):
        return (scale * jax.random.normal(next(keys), shape)).astype(jnp.float32)

    def linear(din, dout):
        return nrm((din, dout)), nrm((1, dout))

    def mha():
        wq, bq = linear(D, D)
        wk, bk = linear(D, D)
        wv, bv = linear(D, D)
        wo, bo = linear(D, D)
        return (wq, bq, wk, bk, wv, bv, wo, bo)

    def maskatt():
        return linear(D, 1)  # weight (D,1), bias (1,1)

    def mlp2(dout):
        w1, b1 = linear(D, M)
        w2, b2 = linear(M, dout)
        return (w1, b1, w2, b2)

    def mapper():
        w1, b1 = linear(D, M)
        w2, b2 = linear(M, 64)
        w3, b3 = linear(64, 1)
        return (w1, b1, w2, b2, w3, b3)

    p = {}
    p["bert_content"] = dict(emb=nrm((vocab, D)), w=nrm((D, D)), b=nrm((1, D)))
    p["bert_ftr"] = dict(emb=nrm((vocab, D)), w=nrm((D, D)), b=nrm((1, D)))
    p["xattn_c2"], p["xattn_c3"] = mha(), mha()
    p["xattn_f2"], p["xattn_f3"] = mha(), mha()
    p["content_att"], p["aggregator"] = maskatt(), maskatt()
    p["simple_att_2"], p["simple_att_3"] = maskatt(), maskatt()
    p["hard_mlp_2"], p["hard_mlp_3"] = mlp2(1), mlp2(1)
    p["simple_mlp_2"], p["simple_mlp_3"] = mlp2(3), mlp2(3)
    p["mlp"] = mlp2(1)
    p["score_mapper_2"], p["score_mapper_3"] = mapper(), mapper()
    return p


# ----------------------------------------------------------------------------
# Main
# ----------------------------------------------------------------------------

if __name__ == "__main__":
    B, Lc, Lf, D, M, VOCAB = 2, 16, 8, 32, 16, 100

    key = jax.random.PRNGKey(0)
    k_param, k_c, k_f2, k_f3 = jax.random.split(key, 4)
    params = init_params(k_param, VOCAB, D, M)

    content = jax.random.randint(k_c, (B, Lc), 0, VOCAB, dtype=jnp.int32)
    ftr2 = jax.random.randint(k_f2, (B, Lf), 0, VOCAB, dtype=jnp.int32)
    ftr3 = jax.random.randint(k_f3, (B, Lf), 0, VOCAB, dtype=jnp.int32)

    content_masks = jnp.ones((B, Lc), jnp.float32).at[1, -4:].set(0.0)
    ftr2_masks = jnp.ones((B, Lf), jnp.float32).at[0, -2:].set(0.0)
    ftr3_masks = jnp.ones((B, Lf), jnp.float32).at[1, -3:].set(0.0)

    res = arg_forward(params, content, content_masks,
                      ftr2, ftr2_masks, ftr3, ftr3_masks)
    res = jax.block_until_ready(res)

    assert res["classify_pred"].shape == (B,)
    assert res["gate_value"].shape == (B, 2)
    assert res["final_feature"].shape == (B, D)
    assert res["content_feature"].shape == (B, D)
    assert res["ftr_2_feature"].shape == (B, D)
    assert res["ftr_3_feature"].shape == (B, D)
    assert res["hard_ftr_2_pred"].shape == (B,)
    assert res["simple_ftr_2_pred"].shape == (B, 3)
    assert res["simple_ftr_3_pred"].shape == (B, 3)
    assert all(bool(jnp.all(jnp.isfinite(v))) for v in jax.tree_util.tree_leaves(res))

    print("KERNEL_OK")
</pallas_src>

<mosaic_0001>
module attributes {stable_mosaic.version = 11 : i64} {
  func.func @fused_arg_kernel(%arg0: i32, %arg1: memref<1x16x32xf32, #tpu.memory_space<vmem>>, %arg2: memref<1x16x32xf32, #tpu.memory_space<vmem>>, %arg3: memref<1x1x16xf32, #tpu.memory_space<vmem>>, %arg4: memref<1x1x8xf32, #tpu.memory_space<vmem>>, %arg5: memref<1x1x8xf32, #tpu.memory_space<vmem>>, %arg6: memref<2x32x32xf32, #tpu.memory_space<vmem>>, %arg7: memref<2x1x32xf32, #tpu.memory_space<vmem>>, %arg8: memref<32x192xf32, #tpu.memory_space<vmem>>, %arg9: memref<1x192xf32, #tpu.memory_space<vmem>>, %arg10: memref<32x96xf32, #tpu.memory_space<vmem>>, %arg11: memref<1x96xf32, #tpu.memory_space<vmem>>, %arg12: memref<32x96xf32, #tpu.memory_space<vmem>>, %arg13: memref<1x96xf32, #tpu.memory_space<vmem>>, %arg14: memref<128x128xf32, #tpu.memory_space<vmem>>, %arg15: memref<1x128xf32, #tpu.memory_space<vmem>>, %arg16: memref<4x32xf32, #tpu.memory_space<vmem>>, %arg17: memref<1x4xf32, #tpu.memory_space<vmem>>, %arg18: memref<5x32x16xf32, #tpu.memory_space<vmem>>, %arg19: memref<5x1x16xf32, #tpu.memory_space<vmem>>, %arg20: memref<5x16x4xf32, #tpu.memory_space<vmem>>, %arg21: memref<5x1x4xf32, #tpu.memory_space<vmem>>, %arg22: memref<2x32x16xf32, #tpu.memory_space<vmem>>, %arg23: memref<2x1x16xf32, #tpu.memory_space<vmem>>, %arg24: memref<2x16x64xf32, #tpu.memory_space<vmem>>, %arg25: memref<2x1x64xf32, #tpu.memory_space<vmem>>, %arg26: memref<2x64x1xf32, #tpu.memory_space<vmem>>, %arg27: memref<2x1x1xf32, #tpu.memory_space<vmem>>, %arg28: memref<1x1x128xf32, #tpu.memory_space<vmem>>, %arg29: memref<1x1x128xf32, #tpu.memory_space<vmem>>) attributes {dimension_semantics = [#tpu.dimension_semantics<parallel>], iteration_bounds = array<i64: 2>, scalar_prefetch = 0 : i64, scratch_operands = 0 : i64, tpu.core_type = #tpu.core_type<tc>, window_params = [{transform_indices = @transform_0, window_bounds = array<i64: 1, 16, 32>}, {transform_indices = @transform_1, window_bounds = array<i64: 1, 16, 32>}, {transform_indices = @transform_2, window_bounds = array<i64: 1, 1, 16>}, {transform_indices = @transform_3, window_bounds = array<i64: 1, 1, 8>}, {transform_indices = @transform_4, window_bounds = array<i64: 1, 1, 8>}, {pipeline_mode = #tpu.pipeline_mode<synchronous>, transform_indices = @transform_5, window_bounds = array<i64: 2, 32, 32>}, {pipeline_mode = #tpu.pipeline_mode<synchronous>, transform_indices = @transform_6, window_bounds = array<i64: 2, 1, 32>}, {pipeline_mode = #tpu.pipeline_mode<synchronous>, transform_indices = @transform_7, window_bounds = array<i64: 32, 192>}, {pipeline_mode = #tpu.pipeline_mode<synchronous>, transform_indices = @transform_8, window_bounds = array<i64: 1, 192>}, {pipeline_mode = #tpu.pipeline_mode<synchronous>, transform_indices = @transform_9, window_bounds = array<i64: 32, 96>}, {pipeline_mode = #tpu.pipeline_mode<synchronous>, transform_indices = @transform_10, window_bounds = array<i64: 1, 96>}, {pipeline_mode = #tpu.pipeline_mode<synchronous>, transform_indices = @transform_11, window_bounds = array<i64: 32, 96>}, {pipeline_mode = #tpu.pipeline_mode<synchronous>, transform_indices = @transform_12, window_bounds = array<i64: 1, 96>}, {pipeline_mode = #tpu.pipeline_mode<synchronous>, transform_indices = @transform_13, window_bounds = array<i64: 128, 128>}, {pipeline_mode = #tpu.pipeline_mode<synchronous>, transform_indices = @transform_14, window_bounds = array<i64: 1, 128>}, {pipeline_mode = #tpu.pipeline_mode<synchronous>, transform_indices = @transform_15, window_bounds = array<i64: 4, 32>}, {pipeline_mode = #tpu.pipeline_mode<synchronous>, transform_indices = @transform_16, window_bounds = array<i64: 1, 4>}, {pipeline_mode = #tpu.pipeline_mode<synchronous>, transform_indices = @transform_17, window_bounds = array<i64: 5, 32, 16>}, {pipeline_mode = #tpu.pipeline_mode<synchronous>, transform_indices = @transform_18, window_bounds = array<i64: 5, 1, 16>}, {pipeline_mode = #tpu.pipeline_mode<synchronous>, transform_indices = @transform_19, window_bounds = array<i64: 5, 16, 4>}, {pipeline_mode = #tpu.pipeline_mode<synchronous>, transform_indices = @transform_20, window_bounds = array<i64: 5, 1, 4>}, {pipeline_mode = #tpu.pipeline_mode<synchronous>, transform_indices = @transform_21, window_bounds = array<i64: 2, 32, 16>}, {pipeline_mode = #tpu.pipeline_mode<synchronous>, transform_indices = @transform_22, window_bounds = array<i64: 2, 1, 16>}, {pipeline_mode = #tpu.pipeline_mode<synchronous>, transform_indices = @transform_23, window_bounds = array<i64: 2, 16, 64>}, {pipeline_mode = #tpu.pipeline_mode<synchronous>, transform_indices = @transform_24, window_bounds = array<i64: 2, 1, 64>}, {pipeline_mode = #tpu.pipeline_mode<synchronous>, transform_indices = @transform_25, window_bounds = array<i64: 2, 64, 1>}, {pipeline_mode = #tpu.pipeline_mode<synchronous>, transform_indices = @transform_26, window_bounds = array<i64: 2, 1, 1>}, {transform_indices = @transform_27, window_bounds = array<i64: 1, 1, 128>}, {transform_indices = @transform_28, window_bounds = array<i64: 1, 1, 128>}]} {
    %c0 = arith.constant 0 : index
    %c0_0 = arith.constant 0 : index
    %c0_1 = arith.constant 0 : index
    %0 = vector.load %arg1[%c0, %c0_0, %c0_1] : memref<1x16x32xf32, #tpu.memory_space<vmem>>, vector<1x16x32xf32>
    %1 = vector.shape_cast %0 : vector<1x16x32xf32> to vector<16x32xf32>
    %c0_2 = arith.constant 0 : index
    %c0_3 = arith.constant 0 : index
    %c0_4 = arith.constant 0 : index
    %2 = vector.load %arg2[%c0_2, %c0_3, %c0_4] : memref<1x16x32xf32, #tpu.memory_space<vmem>>, vector<1x16x32xf32>
    %3 = vector.shape_cast %2 : vector<1x16x32xf32> to vector<16x32xf32>
    %c0_5 = arith.constant 0 : index
    %c0_6 = arith.constant 0 : index
    %c0_7 = arith.constant 0 : index
    %4 = vector.load %arg3[%c0_5, %c0_6, %c0_7] : memref<1x1x16xf32, #tpu.memory_space<vmem>>, vector<1x1x16xf32>
    %5 = vector.shape_cast %4 : vector<1x1x16xf32> to vector<1x16xf32>
    %c0_8 = arith.constant 0 : index
    %c0_9 = arith.constant 0 : index
    %c0_10 = arith.constant 0 : index
    %6 = vector.load %arg4[%c0_8, %c0_9, %c0_10] : memref<1x1x8xf32, #tpu.memory_space<vmem>>, vector<1x1x8xf32>
    %7 = vector.shape_cast %6 : vector<1x1x8xf32> to vector<1x8xf32>
    %c0_11 = arith.constant 0 : index
    %c0_12 = arith.constant 0 : index
    %c0_13 = arith.constant 0 : index
    %8 = vector.load %arg5[%c0_11, %c0_12, %c0_13] : memref<1x1x8xf32, #tpu.memory_space<vmem>>, vector<1x1x8xf32>
    %9 = vector.shape_cast %8 : vector<1x1x8xf32> to vector<1x8xf32>
    %c0_14 = arith.constant 0 : index
    %c0_15 = arith.constant 0 : index
    %c0_16 = arith.constant 0 : index
    %10 = vector.load %arg6[%c0_14, %c0_15, %c0_16] : memref<2x32x32xf32, #tpu.memory_space<vmem>>, vector<1x32x32xf32>
    %11 = vector.shape_cast %10 : vector<1x32x32xf32> to vector<32x32xf32>
    %cst = arith.constant dense<0.000000e+00> : vector<16x32xf32>
    %12 = tpu.matmul %1, %11, %cst {dimension_numbers = #tpu.dot_dimension_numbers<[1], [0], [0], [1], [0, 0, 1, 1], [], []>} : vector<16x32xf32>, vector<32x32xf32>, vector<16x32xf32> -> vector<16x32xf32>
    %c0_17 = arith.constant 0 : index
    %c0_18 = arith.constant 0 : index
    %c0_19 = arith.constant 0 : index
    %13 = vector.load %arg7[%c0_17, %c0_18, %c0_19] : memref<2x1x32xf32, #tpu.memory_space<vmem>>, vector<1x1x32xf32>
    %14 = vector.shape_cast %13 : vector<1x1x32xf32> to vector<1x32xf32>
    %15 = vector.broadcast %14 : vector<1x32xf32> to vector<16x32xf32>
    %16 = arith.addf %12, %15 : vector<16x32xf32>
    %17 = math.tanh %16 : vector<16x32xf32>
    %c1 = arith.constant 1 : index
    %c0_20 = arith.constant 0 : index
    %c0_21 = arith.constant 0 : index
    %18 = vector.load %arg6[%c1, %c0_20, %c0_21] : memref<2x32x32xf32, #tpu.memory_space<vmem>>, vector<1x32x32xf32>
    %19 = vector.shape_cast %18 : vector<1x32x32xf32> to vector<32x32xf32>
    %cst_22 = arith.constant dense<0.000000e+00> : vector<16x32xf32>
    %20 = tpu.matmul %3, %19, %cst_22 {dimension_numbers = #tpu.dot_dimension_numbers<[1], [0], [0], [1], [0, 0, 1, 1], [], []>} : vector<16x32xf32>, vector<32x32xf32>, vector<16x32xf32> -> vector<16x32xf32>
    %c1_23 = arith.constant 1 : index
    %c0_24 = arith.constant 0 : index
    %c0_25 = arith.constant 0 : index
    %21 = vector.load %arg7[%c1_23, %c0_24, %c0_25] : memref<2x1x32xf32, #tpu.memory_space<vmem>>, vector<1x1x32xf32>
    %22 = vector.shape_cast %21 : vector<1x1x32xf32> to vector<1x32xf32>
    %23 = vector.broadcast %22 : vector<1x32xf32> to vector<16x32xf32>
    %24 = arith.addf %20, %23 : vector<16x32xf32>
    %25 = math.tanh %24 : vector<16x32xf32>
    %26 = vector.extract_strided_slice %25 {offsets = [0, 0], sizes = [8, 32], strides = [1, 1]} : vector<16x32xf32> to vector<8x32xf32>
    %27 = vector.extract_strided_slice %25 {offsets = [8, 0], sizes = [8, 32], strides = [1, 1]} : vector<16x32xf32> to vector<8x32xf32>
    %c0_26 = arith.constant 0 : index
    %c0_27 = arith.constant 0 : index
    %28 = vector.load %arg8[%c0_26, %c0_27] : memref<32x192xf32, #tpu.memory_space<vmem>>, vector<32x192xf32>
    %cst_28 = arith.constant dense<0.000000e+00> : vector<16x192xf32>
    %29 = tpu.matmul %17, %28, %cst_28 {dimension_numbers = #tpu.dot_dimension_numbers<[1], [0], [0], [1], [0, 0, 1, 1], [], []>} : vector<16x32xf32>, vector<32x192xf32>, vector<16x192xf32> -> vector<16x192xf32>
    %c0_29 = arith.constant 0 : index
    %c0_30 = arith.constant 0 : index
    %30 = vector.load %arg9[%c0_29, %c0_30] : memref<1x192xf32, #tpu.memory_space<vmem>>, vector<1x192xf32>
    %31 = vector.broadcast %30 : vector<1x192xf32> to vector<16x192xf32>
    %32 = arith.addf %29, %31 : vector<16x192xf32>
    %c0_31 = arith.constant 0 : index
    %c0_32 = arith.constant 0 : index
    %33 = vector.load %arg10[%c0_31, %c0_32] : memref<32x96xf32, #tpu.memory_space<vmem>>, vector<32x96xf32>
    %cst_33 = arith.constant dense<0.000000e+00> : vector<8x96xf32>
    %34 = tpu.matmul %26, %33, %cst_33 {dimension_numbers = #tpu.dot_dimension_numbers<[1], [0], [0], [1], [0, 0, 1, 1], [], []>} : vector<8x32xf32>, vector<32x96xf32>, vector<8x96xf32> -> vector<8x96xf32>
    %c0_34 = arith.constant 0 : index
    %c0_35 = arith.constant 0 : index
    %35 = vector.load %arg11[%c0_34, %c0_35] : memref<1x96xf32, #tpu.memory_space<vmem>>, vector<1x96xf32>
    %36 = vector.broadcast %35 : vector<1x96xf32> to vector<8x96xf32>
    %37 = arith.addf %34, %36 : vector<8x96xf32>
    %c0_36 = arith.constant 0 : index
    %c0_37 = arith.constant 0 : index
    %38 = vector.load %arg12[%c0_36, %c0_37] : memref<32x96xf32, #tpu.memory_space<vmem>>, vector<32x96xf32>
    %cst_38 = arith.constant dense<0.000000e+00> : vector<8x96xf32>
    %39 = tpu.matmul %27, %38, %cst_38 {dimension_numbers = #tpu.dot_dimension_numbers<[1], [0], [0], [1], [0, 0, 1, 1], [], []>} : vector<8x32xf32>, vector<32x96xf32>, vector<8x96xf32> -> vector<8x96xf32>
    %c0_39 = arith.constant 0 : index
    %c0_40 = arith.constant 0 : index
    %40 = vector.load %arg13[%c0_39, %c0_40] : memref<1x96xf32, #tpu.memory_space<vmem>>, vector<1x96xf32>
    %41 = vector.broadcast %40 : vector<1x96xf32> to vector<8x96xf32>
    %42 = arith.addf %39, %41 : vector<8x96xf32>
    %43 = vector.extract_strided_slice %32 {offsets = [0, 0], sizes = [16, 32], strides = [1, 1]} : vector<16x192xf32> to vector<16x32xf32>
    %44 = vector.extract_strided_slice %32 {offsets = [0, 32], sizes = [16, 32], strides = [1, 1]} : vector<16x192xf32> to vector<16x32xf32>
    %45 = vector.extract_strided_slice %32 {offsets = [0, 64], sizes = [16, 32], strides = [1, 1]} : vector<16x192xf32> to vector<16x32xf32>
    %46 = vector.extract_strided_slice %32 {offsets = [0, 96], sizes = [16, 32], strides = [1, 1]} : vector<16x192xf32> to vector<16x32xf32>
    %47 = vector.extract_strided_slice %32 {offsets = [0, 128], sizes = [16, 32], strides = [1, 1]} : vector<16x192xf32> to vector<16x32xf32>
    %48 = vector.extract_strided_slice %32 {offsets = [0, 160], sizes = [16, 32], strides = [1, 1]} : vector<16x192xf32> to vector<16x32xf32>
    %49 = vector.extract_strided_slice %37 {offsets = [0, 0], sizes = [8, 32], strides = [1, 1]} : vector<8x96xf32> to vector<8x32xf32>
    %50 = vector.extract_strided_slice %37 {offsets = [0, 32], sizes = [8, 32], strides = [1, 1]} : vector<8x96xf32> to vector<8x32xf32>
    %51 = vector.extract_strided_slice %37 {offsets = [0, 64], sizes = [8, 32], strides = [1, 1]} : vector<8x96xf32> to vector<8x32xf32>
    %52 = vector.extract_strided_slice %42 {offsets = [0, 0], sizes = [8, 32], strides = [1, 1]} : vector<8x96xf32> to vector<8x32xf32>
    %53 = vector.extract_strided_slice %42 {offsets = [0, 32], sizes = [8, 32], strides = [1, 1]} : vector<8x96xf32> to vector<8x32xf32>
    %54 = vector.extract_strided_slice %42 {offsets = [0, 64], sizes = [8, 32], strides = [1, 1]} : vector<8x96xf32> to vector<8x32xf32>
    %cst_41 = arith.constant dense<0.000000e+00> : vector<8x16xf32>
    %55 = tpu.matmul %49, %43, %cst_41 {dimension_numbers = #tpu.dot_dimension_numbers<[1], [1], [0], [0], [0, 0, 1, 0], [], []>} : vector<8x32xf32>, vector<16x32xf32>, vector<8x16xf32> -> vector<8x16xf32>
    %cst_42 = arith.constant 0.176776692 : f32
    %56 = vector.broadcast %cst_42 : f32 to vector<8x16xf32>
    %57 = arith.mulf %55, %56 : vector<8x16xf32>
    %cst_43 = arith.constant 0.000000e+00 : f32
    %58 = vector.broadcast %cst_43 : f32 to vector<1x16xf32>
    %59 = arith.cmpf oeq, %5, %58 : vector<1x16xf32>
    %cst_44 = arith.constant -1.000000e+09 : f32
    %60 = vector.shape_cast %59 : vector<1x16xi1> to vector<1x16xi1>
    %61 = vector.broadcast %60 : vector<1x16xi1> to vector<8x16xi1>
    %62 = vector.broadcast %cst_44 : f32 to vector<8x16xf32>
    %63 = arith.select %61, %62, %57 : vector<8x16xi1>, vector<8x16xf32>
    %cst_45 = arith.constant dense<0xFF800000> : vector<8xf32>
    %64 = vector.multi_reduction <maximumf>, %63, %cst_45 [1] : vector<8x16xf32> to vector<8xf32>
    %65 = vector.shape_cast %64 : vector<8xf32> to vector<8x1xf32>
    %66 = vector.broadcast %65 : vector<8x1xf32> to vector<8x16xf32>
    %67 = arith.subf %63, %66 : vector<8x16xf32>
    %68 = math.exp %67 : vector<8x16xf32>
    %cst_46 = arith.constant dense<0.000000e+00> : vector<8xf32>
    %69 = vector.multi_reduction <add>, %68, %cst_46 [1] : vector<8x16xf32> to vector<8xf32>
    %70 = vector.shape_cast %69 : vector<8xf32> to vector<8x1xf32>
    %71 = vector.broadcast %70 : vector<8x1xf32> to vector<8x16xf32>
    %72 = arith.divf %68, %71 : vector<8x16xf32>
    %cst_47 = arith.constant dense<0.000000e+00> : vector<16xf32>
    %73 = vector.multi_reduction <add>, %72, %cst_47 [0] : vector<8x16xf32> to vector<16xf32>
    %74 = vector.shape_cast %73 : vector<16xf32> to vector<1x16xf32>
    %cst_48 = arith.constant 8.000000e+00 : f32
    %75 = vector.broadcast %cst_48 : f32 to vector<1x16xf32>
    %76 = arith.divf %74, %75 : vector<1x16xf32>
    %cst_49 = arith.constant dense<0.000000e+00> : vector<1x32xf32>
    %77 = tpu.matmul %76, %44, %cst_49 {dimension_numbers = #tpu.dot_dimension_numbers<[1], [0], [0], [1], [0, 0, 1, 1], [], []>} : vector<1x16xf32>, vector<16x32xf32>, vector<1x32xf32> -> vector<1x32xf32>
    %cst_50 = arith.constant dense<0.000000e+00> : vector<8x16xf32>
    %78 = tpu.matmul %52, %45, %cst_50 {dimension_numbers = #tpu.dot_dimension_numbers<[1], [1], [0], [0], [0, 0, 1, 0], [], []>} : vector<8x32xf32>, vector<16x32xf32>, vector<8x16xf32> -> vector<8x16xf32>
    %cst_51 = arith.constant 0.176776692 : f32
    %79 = vector.broadcast %cst_51 : f32 to vector<8x16xf32>
    %80 = arith.mulf %78, %79 : vector<8x16xf32>
    %cst_52 = arith.constant 0.000000e+00 : f32
    %81 = vector.broadcast %cst_52 : f32 to vector<1x16xf32>
    %82 = arith.cmpf oeq, %5, %81 : vector<1x16xf32>
    %cst_53 = arith.constant -1.000000e+09 : f32
    %83 = vector.shape_cast %82 : vector<1x16xi1> to vector<1x16xi1>
    %84 = vector.broadcast %83 : vector<1x16xi1> to vector<8x16xi1>
    %85 = vector.broadcast %cst_53 : f32 to vector<8x16xf32>
    %86 = arith.select %84, %85, %80 : vector<8x16xi1>, vector<8x16xf32>
    %cst_54 = arith.constant dense<0xFF800000> : vector<8xf32>
    %87 = vector.multi_reduction <maximumf>, %86, %cst_54 [1] : vector<8x16xf32> to vector<8xf32>
    %88 = vector.shape_cast %87 : vector<8xf32> to vector<8x1xf32>
    %89 = vector.broadcast %88 : vector<8x1xf32> to vector<8x16xf32>
    %90 = arith.subf %86, %89 : vector<8x16xf32>
    %91 = math.exp %90 : vector<8x16xf32>
    %cst_55 = arith.constant dense<0.000000e+00> : vector<8xf32>
    %92 = vector.multi_reduction <add>, %91, %cst_55 [1] : vector<8x16xf32> to vector<8xf32>
    %93 = vector.shape_cast %92 : vector<8xf32> to vector<8x1xf32>
    %94 = vector.broadcast %93 : vector<8x1xf32> to vector<8x16xf32>
    %95 = arith.divf %91, %94 : vector<8x16xf32>
    %cst_56 = arith.constant dense<0.000000e+00> : vector<16xf32>
    %96 = vector.multi_reduction <add>, %95, %cst_56 [0] : vector<8x16xf32> to vector<16xf32>
    %97 = vector.shape_cast %96 : vector<16xf32> to vector<1x16xf32>
    %cst_57 = arith.constant 8.000000e+00 : f32
    %98 = vector.broadcast %cst_57 : f32 to vector<1x16xf32>
    %99 = arith.divf %97, %98 : vector<1x16xf32>
    %cst_58 = arith.constant dense<0.000000e+00> : vector<1x32xf32>
    %100 = tpu.matmul %99, %46, %cst_58 {dimension_numbers = #tpu.dot_dimension_numbers<[1], [0], [0], [1], [0, 0, 1, 1], [], []>} : vector<1x16xf32>, vector<16x32xf32>, vector<1x32xf32> -> vector<1x32xf32>
    %cst_59 = arith.constant dense<0.000000e+00> : vector<16x8xf32>
    %101 = tpu.matmul %47, %50, %cst_59 {dimension_numbers = #tpu.dot_dimension_numbers<[1], [1], [0], [0], [0, 0, 1, 0], [], []>} : vector<16x32xf32>, vector<8x32xf32>, vector<16x8xf32> -> vector<16x8xf32>
    %cst_60 = arith.constant 0.176776692 : f32
    %102 = vector.broadcast %cst_60 : f32 to vector<16x8xf32>
    %103 = arith.mulf %101, %102 : vector<16x8xf32>
    %cst_61 = arith.constant 0.000000e+00 : f32
    %104 = vector.broadcast %cst_61 : f32 to vector<1x8xf32>
    %105 = arith.cmpf oeq, %7, %104 : vector<1x8xf32>
    %cst_62 = arith.constant -1.000000e+09 : f32
    %106 = vector.shape_cast %105 : vector<1x8xi1> to vector<1x8xi1>
    %107 = vector.broadcast %106 : vector<1x8xi1> to vector<16x8xi1>
    %108 = vector.broadcast %cst_62 : f32 to vector<16x8xf32>
    %109 = arith.select %107, %108, %103 : vector<16x8xi1>, vector<16x8xf32>
    %cst_63 = arith.constant dense<0xFF800000> : vector<16xf32>
    %110 = vector.multi_reduction <maximumf>, %109, %cst_63 [1] : vector<16x8xf32> to vector<16xf32>
    %111 = vector.shape_cast %110 : vector<16xf32> to vector<16x1xf32>
    %112 = vector.broadcast %111 : vector<16x1xf32> to vector<16x8xf32>
    %113 = arith.subf %109, %112 : vector<16x8xf32>
    %114 = math.exp %113 : vector<16x8xf32>
    %cst_64 = arith.constant dense<0.000000e+00> : vector<16xf32>
    %115 = vector.multi_reduction <add>, %114, %cst_64 [1] : vector<16x8xf32> to vector<16xf32>
    %116 = vector.shape_cast %115 : vector<16xf32> to vector<16x1xf32>
    %117 = vector.broadcast %116 : vector<16x1xf32> to vector<16x8xf32>
    %118 = arith.divf %114, %117 : vector<16x8xf32>
    %cst_65 = arith.constant dense<0.000000e+00> : vector<8xf32>
    %119 = vector.multi_reduction <add>, %118, %cst_65 [0] : vector<16x8xf32> to vector<8xf32>
    %120 = vector.shape_cast %119 : vector<8xf32> to vector<1x8xf32>
    %cst_66 = arith.constant 1.600000e+01 : f32
    %121 = vector.broadcast %cst_66 : f32 to vector<1x8xf32>
    %122 = arith.divf %120, %121 : vector<1x8xf32>
    %cst_67 = arith.constant dense<0.000000e+00> : vector<1x32xf32>
    %123 = tpu.matmul %122, %51, %cst_67 {dimension_numbers = #tpu.dot_dimension_numbers<[1], [0], [0], [1], [0, 0, 1, 1], [], []>} : vector<1x8xf32>, vector<8x32xf32>, vector<1x32xf32> -> vector<1x32xf32>
    %cst_68 = arith.constant dense<0.000000e+00> : vector<16x8xf32>
    %124 = tpu.matmul %48, %53, %cst_68 {dimension_numbers = #tpu.dot_dimension_numbers<[1], [1], [0], [0], [0, 0, 1, 0], [], []>} : vector<16x32xf32>, vector<8x32xf32>, vector<16x8xf32> -> vector<16x8xf32>
    %cst_69 = arith.constant 0.176776692 : f32
    %125 = vector.broadcast %cst_69 : f32 to vector<16x8xf32>
    %126 = arith.mulf %124, %125 : vector<16x8xf32>
    %cst_70 = arith.constant 0.000000e+00 : f32
    %127 = vector.broadcast %cst_70 : f32 to vector<1x8xf32>
    %128 = arith.cmpf oeq, %9, %127 : vector<1x8xf32>
    %cst_71 = arith.constant -1.000000e+09 : f32
    %129 = vector.shape_cast %128 : vector<1x8xi1> to vector<1x8xi1>
    %130 = vector.broadcast %129 : vector<1x8xi1> to vector<16x8xi1>
    %131 = vector.broadcast %cst_71 : f32 to vector<16x8xf32>
    %132 = arith.select %130, %131, %126 : vector<16x8xi1>, vector<16x8xf32>
    %cst_72 = arith.constant dense<0xFF800000> : vector<16xf32>
    %133 = vector.multi_reduction <maximumf>, %132, %cst_72 [1] : vector<16x8xf32> to vector<16xf32>
    %134 = vector.shape_cast %133 : vector<16xf32> to vector<16x1xf32>
    %135 = vector.broadcast %134 : vector<16x1xf32> to vector<16x8xf32>
    %136 = arith.subf %132, %135 : vector<16x8xf32>
    %137 = math.exp %136 : vector<16x8xf32>
    %cst_73 = arith.constant dense<0.000000e+00> : vector<16xf32>
    %138 = vector.multi_reduction <add>, %137, %cst_73 [1] : vector<16x8xf32> to vector<16xf32>
    %139 = vector.shape_cast %138 : vector<16xf32> to vector<16x1xf32>
    %140 = vector.broadcast %139 : vector<16x1xf32> to vector<16x8xf32>
    %141 = arith.divf %137, %140 : vector<16x8xf32>
    %cst_74 = arith.constant dense<0.000000e+00> : vector<8xf32>
    %142 = vector.multi_reduction <add>, %141, %cst_74 [0] : vector<16x8xf32> to vector<8xf32>
    %143 = vector.shape_cast %142 : vector<8xf32> to vector<1x8xf32>
    %cst_75 = arith.constant 1.600000e+01 : f32
    %144 = vector.broadcast %cst_75 : f32 to vector<1x8xf32>
    %145 = arith.divf %143, %144 : vector<1x8xf32>
    %cst_76 = arith.constant dense<0.000000e+00> : vector<1x32xf32>
    %146 = tpu.matmul %145, %54, %cst_76 {dimension_numbers = #tpu.dot_dimension_numbers<[1], [0], [0], [1], [0, 0, 1, 1], [], []>} : vector<1x8xf32>, vector<8x32xf32>, vector<1x32xf32> -> vector<1x32xf32>
    %147 = tpu.concatenate %77, %100, %123, %146 in 1 : vector<1x32xf32>, vector<1x32xf32>, vector<1x32xf32>, vector<1x32xf32> -> vector<1x128xf32>
    %c0_77 = arith.constant 0 : index
    %c0_78 = arith.constant 0 : index
    %148 = vector.load %arg14[%c0_77, %c0_78] : memref<128x128xf32, #tpu.memory_space<vmem>>, vector<128x128xf32>
    %cst_79 = arith.constant dense<0.000000e+00> : vector<1x128xf32>
    %149 = tpu.matmul %147, %148, %cst_79 {dimension_numbers = #tpu.dot_dimension_numbers<[1], [0], [0], [1], [0, 0, 1, 1], [], []>} : vector<1x128xf32>, vector<128x128xf32>, vector<1x128xf32> -> vector<1x128xf32>
    %c0_80 = arith.constant 0 : index
    %c0_81 = arith.constant 0 : index
    %150 = vector.load %arg15[%c0_80, %c0_81] : memref<1x128xf32, #tpu.memory_space<vmem>>, vector<1x128xf32>
    %151 = arith.addf %149, %150 : vector<1x128xf32>
    %152 = vector.extract_strided_slice %151 {offsets = [0, 0], sizes = [1, 32], strides = [1, 1]} : vector<1x128xf32> to vector<1x32xf32>
    %153 = vector.extract_strided_slice %151 {offsets = [0, 32], sizes = [1, 32], strides = [1, 1]} : vector<1x128xf32> to vector<1x32xf32>
    %154 = vector.extract_strided_slice %151 {offsets = [0, 64], sizes = [1, 32], strides = [1, 1]} : vector<1x128xf32> to vector<1x32xf32>
    %155 = vector.extract_strided_slice %151 {offsets = [0, 96], sizes = [1, 32], strides = [1, 1]} : vector<1x128xf32> to vector<1x32xf32>
    %c0_82 = arith.constant 0 : index
    %c0_83 = arith.constant 0 : index
    %156 = vector.load %arg16[%c0_82, %c0_83] : memref<4x32xf32, #tpu.memory_space<vmem>>, vector<1x32xf32>
    %c0_84 = arith.constant 0 : index
    %c0_85 = arith.constant 0 : index
    %157 = vector.load %arg17[%c0_84, %c0_85] : memref<1x4xf32, #tpu.memory_space<vmem>>, vector<1x1xf32>
    %cst_86 = arith.constant dense<0.000000e+00> : vector<1x16xf32>
    %158 = tpu.matmul %156, %17, %cst_86 {dimension_numbers = #tpu.dot_dimension_numbers<[1], [1], [0], [0], [0, 0, 1, 0], [], []>} : vector<1x32xf32>, vector<16x32xf32>, vector<1x16xf32> -> vector<1x16xf32>
    %159 = vector.broadcast %157 : vector<1x1xf32> to vector<1x16xf32>
    %160 = arith.addf %158, %159 : vector<1x16xf32>
    %cst_87 = arith.constant 0.000000e+00 : f32
    %161 = vector.broadcast %cst_87 : f32 to vector<1x16xf32>
    %162 = arith.cmpf oeq, %5, %161 : vector<1x16xf32>
    %cst_88 = arith.constant -1.000000e+09 : f32
    %163 = vector.broadcast %cst_88 : f32 to vector<1x16xf32>
    %164 = arith.select %162, %163, %160 : vector<1x16xi1>, vector<1x16xf32>
    %cst_89 = arith.constant dense<0xFF800000> : vector<1xf32>
    %165 = vector.multi_reduction <maximumf>, %164, %cst_89 [1] : vector<1x16xf32> to vector<1xf32>
    %166 = vector.shape_cast %165 : vector<1xf32> to vector<1x1xf32>
    %167 = vector.broadcast %166 : vector<1x1xf32> to vector<1x16xf32>
    %168 = arith.subf %164, %167 : vector<1x16xf32>
    %169 = math.exp %168 : vector<1x16xf32>
    %cst_90 = arith.constant dense<0.000000e+00> : vector<1xf32>
    %170 = vector.multi_reduction <add>, %169, %cst_90 [1] : vector<1x16xf32> to vector<1xf32>
    %171 = vector.shape_cast %170 : vector<1xf32> to vector<1x1xf32>
    %172 = vector.broadcast %171 : vector<1x1xf32> to vector<1x16xf32>
    %173 = arith.divf %169, %172 : vector<1x16xf32>
    %cst_91 = arith.constant dense<0.000000e+00> : vector<1x32xf32>
    %174 = tpu.matmul %173, %17, %cst_91 {dimension_numbers = #tpu.dot_dimension_numbers<[1], [0], [0], [1], [0, 0, 1, 1], [], []>} : vector<1x16xf32>, vector<16x32xf32>, vector<1x32xf32> -> vector<1x32xf32>
    %c1_92 = arith.constant 1 : index
    %c0_93 = arith.constant 0 : index
    %175 = vector.load %arg16[%c1_92, %c0_93] : memref<4x32xf32, #tpu.memory_space<vmem>>, vector<1x32xf32>
    %c0_94 = arith.constant 0 : index
    %c1_95 = arith.constant 1 : index
    %176 = vector.load %arg17[%c0_94, %c1_95] : memref<1x4xf32, #tpu.memory_space<vmem>>, vector<1x1xf32>
    %cst_96 = arith.constant dense<0.000000e+00> : vector<1x8xf32>
    %177 = tpu.matmul %175, %26, %cst_96 {dimension_numbers = #tpu.dot_dimension_numbers<[1], [1], [0], [0], [0, 0, 1, 0], [], []>} : vector<1x32xf32>, vector<8x32xf32>, vector<1x8xf32> -> vector<1x8xf32>
    %178 = vector.broadcast %176 : vector<1x1xf32> to vector<1x8xf32>
    %179 = arith.addf %177, %178 : vector<1x8xf32>
    %cst_97 = arith.constant dense<0xFF800000> : vector<1xf32>
    %180 = vector.multi_reduction <maximumf>, %179, %cst_97 [1] : vector<1x8xf32> to vector<1xf32>
    %181 = vector.shape_cast %180 : vector<1xf32> to vector<1x1xf32>
    %182 = vector.broadcast %181 : vector<1x1xf32> to vector<1x8xf32>
    %183 = arith.subf %179, %182 : vector<1x8xf32>
    %184 = math.exp %183 : vector<1x8xf32>
    %cst_98 = arith.constant dense<0.000000e+00> : vector<1xf32>
    %185 = vector.multi_reduction <add>, %184, %cst_98 [1] : vector<1x8xf32> to vector<1xf32>
    %186 = vector.shape_cast %185 : vector<1xf32> to vector<1x1xf32>
    %187 = vector.broadcast %186 : vector<1x1xf32> to vector<1x8xf32>
    %188 = arith.divf %184, %187 : vector<1x8xf32>
    %cst_99 = arith.constant dense<0.000000e+00> : vector<1x32xf32>
    %189 = tpu.matmul %188, %26, %cst_99 {dimension_numbers = #tpu.dot_dimension_numbers<[1], [0], [0], [1], [0, 0, 1, 1], [], []>} : vector<1x8xf32>, vector<8x32xf32>, vector<1x32xf32> -> vector<1x32xf32>
    %c2 = arith.constant 2 : index
    %c0_100 = arith.constant 0 : index
    %190 = vector.load %arg16[%c2, %c0_100] : memref<4x32xf32, #tpu.memory_space<vmem>>, vector<1x32xf32>
    %c0_101 = arith.constant 0 : index
    %c2_102 = arith.constant 2 : index
    %191 = vector.load %arg17[%c0_101, %c2_102] : memref<1x4xf32, #tpu.memory_space<vmem>>, vector<1x1xf32>
    %cst_103 = arith.constant dense<0.000000e+00> : vector<1x8xf32>
    %192 = tpu.matmul %190, %27, %cst_103 {dimension_numbers = #tpu.dot_dimension_numbers<[1], [1], [0], [0], [0, 0, 1, 0], [], []>} : vector<1x32xf32>, vector<8x32xf32>, vector<1x8xf32> -> vector<1x8xf32>
    %193 = vector.broadcast %191 : vector<1x1xf32> to vector<1x8xf32>
    %194 = arith.addf %192, %193 : vector<1x8xf32>
    %cst_104 = arith.constant dense<0xFF800000> : vector<1xf32>
    %195 = vector.multi_reduction <maximumf>, %194, %cst_104 [1] : vector<1x8xf32> to vector<1xf32>
    %196 = vector.shape_cast %195 : vector<1xf32> to vector<1x1xf32>
    %197 = vector.broadcast %196 : vector<1x1xf32> to vector<1x8xf32>
    %198 = arith.subf %194, %197 : vector<1x8xf32>
    %199 = math.exp %198 : vector<1x8xf32>
    %cst_105 = arith.constant dense<0.000000e+00> : vector<1xf32>
    %200 = vector.multi_reduction <add>, %199, %cst_105 [1] : vector<1x8xf32> to vector<1xf32>
    %201 = vector.shape_cast %200 : vector<1xf32> to vector<1x1xf32>
    %202 = vector.broadcast %201 : vector<1x1xf32> to vector<1x8xf32>
    %203 = arith.divf %199, %202 : vector<1x8xf32>
    %cst_106 = arith.constant dense<0.000000e+00> : vector<1x32xf32>
    %204 = tpu.matmul %203, %27, %cst_106 {dimension_numbers = #tpu.dot_dimension_numbers<[1], [0], [0], [1], [0, 0, 1, 1], [], []>} : vector<1x8xf32>, vector<8x32xf32>, vector<1x32xf32> -> vector<1x32xf32>
    %c0_107 = arith.constant 0 : index
    %c0_108 = arith.constant 0 : index
    %c0_109 = arith.constant 0 : index
    %205 = vector.load %arg18[%c0_107, %c0_108, %c0_109] : memref<5x32x16xf32, #tpu.memory_space<vmem>>, vector<1x32x16xf32>
    %206 = vector.shape_cast %205 : vector<1x32x16xf32> to vector<32x16xf32>
    %cst_110 = arith.constant dense<0.000000e+00> : vector<1x16xf32>
    %207 = tpu.matmul %154, %206, %cst_110 {dimension_numbers = #tpu.dot_dimension_numbers<[1], [0], [0], [1], [0, 0, 1, 1], [], []>} : vector<1x32xf32>, vector<32x16xf32>, vector<1x16xf32> -> vector<1x16xf32>
    %c0_111 = arith.constant 0 : index
    %c0_112 = arith.constant 0 : index
    %c0_113 = arith.constant 0 : index
    %208 = vector.load %arg19[%c0_111, %c0_112, %c0_113] : memref<5x1x16xf32, #tpu.memory_space<vmem>>, vector<1x1x16xf32>
    %209 = vector.shape_cast %208 : vector<1x1x16xf32> to vector<1x16xf32>
    %210 = arith.addf %207, %209 : vector<1x16xf32>
    %cst_114 = arith.constant 0.000000e+00 : f32
    %211 = vector.broadcast %cst_114 : f32 to vector<1x16xf32>
    %212 = arith.maximumf %210, %211 : vector<1x16xf32>
    %c0_115 = arith.constant 0 : index
    %c0_116 = arith.constant 0 : index
    %c0_117 = arith.constant 0 : index
    %213 = vector.load %arg20[%c0_115, %c0_116, %c0_117] : memref<5x16x4xf32, #tpu.memory_space<vmem>>, vector<1x16x4xf32>
    %214 = vector.shape_cast %213 : vector<1x16x4xf32> to vector<16x4xf32>
    %cst_118 = arith.constant dense<0.000000e+00> : vector<1x4xf32>
    %215 = tpu.matmul %212, %214, %cst_118 {dimension_numbers = #tpu.dot_dimension_numbers<[1], [0], [0], [1], [0, 0, 1, 1], [], []>} : vector<1x16xf32>, vector<16x4xf32>, vector<1x4xf32> -> vector<1x4xf32>
    %c0_119 = arith.constant 0 : index
    %c0_120 = arith.constant 0 : index
    %c0_121 = arith.constant 0 : index
    %216 = vector.load %arg21[%c0_119, %c0_120, %c0_121] : memref<5x1x4xf32, #tpu.memory_space<vmem>>, vector<1x1x4xf32>
    %217 = vector.shape_cast %216 : vector<1x1x4xf32> to vector<1x4xf32>
    %218 = arith.addf %215, %217 : vector<1x4xf32>
    %219 = vector.extract_strided_slice %218 {offsets = [0, 0], sizes = [1, 1], strides = [1, 1]} : vector<1x4xf32> to vector<1x1xf32>
    %cst_122 = arith.constant 0.000000e+00 : f32
    %220 = vector.broadcast %cst_122 : f32 to vector<1x1xf32>
    %221 = arith.subf %220, %219 : vector<1x1xf32>
    %222 = math.exp %221 : vector<1x1xf32>
    %cst_123 = arith.constant 1.000000e+00 : f32
    %223 = vector.broadcast %cst_123 : f32 to vector<1x1xf32>
    %224 = arith.addf %223, %222 : vector<1x1xf32>
    %cst_124 = arith.constant 1.000000e+00 : f32
    %225 = vector.broadcast %cst_124 : f32 to vector<1x1xf32>
    %226 = arith.divf %225, %224 : vector<1x1xf32>
    %c1_125 = arith.constant 1 : index
    %c0_126 = arith.constant 0 : index
    %c0_127 = arith.constant 0 : index
    %227 = vector.load %arg18[%c1_125, %c0_126, %c0_127] : memref<5x32x16xf32, #tpu.memory_space<vmem>>, vector<1x32x16xf32>
    %228 = vector.shape_cast %227 : vector<1x32x16xf32> to vector<32x16xf32>
    %cst_128 = arith.constant dense<0.000000e+00> : vector<1x16xf32>
    %229 = tpu.matmul %155, %228, %cst_128 {dimension_numbers = #tpu.dot_dimension_numbers<[1], [0], [0], [1], [0, 0, 1, 1], [], []>} : vector<1x32xf32>, vector<32x16xf32>, vector<1x16xf32> -> vector<1x16xf32>
    %c1_129 = arith.constant 1 : index
    %c0_130 = arith.constant 0 : index
    %c0_131 = arith.constant 0 : index
    %230 = vector.load %arg19[%c1_129, %c0_130, %c0_131] : memref<5x1x16xf32, #tpu.memory_space<vmem>>, vector<1x1x16xf32>
    %231 = vector.shape_cast %230 : vector<1x1x16xf32> to vector<1x16xf32>
    %232 = arith.addf %229, %231 : vector<1x16xf32>
    %cst_132 = arith.constant 0.000000e+00 : f32
    %233 = vector.broadcast %cst_132 : f32 to vector<1x16xf32>
    %234 = arith.maximumf %232, %233 : vector<1x16xf32>
    %c1_133 = arith.constant 1 : index
    %c0_134 = arith.constant 0 : index
    %c0_135 = arith.constant 0 : index
    %235 = vector.load %arg20[%c1_133, %c0_134, %c0_135] : memref<5x16x4xf32, #tpu.memory_space<vmem>>, vector<1x16x4xf32>
    %236 = vector.shape_cast %235 : vector<1x16x4xf32> to vector<16x4xf32>
    %cst_136 = arith.constant dense<0.000000e+00> : vector<1x4xf32>
    %237 = tpu.matmul %234, %236, %cst_136 {dimension_numbers = #tpu.dot_dimension_numbers<[1], [0], [0], [1], [0, 0, 1, 1], [], []>} : vector<1x16xf32>, vector<16x4xf32>, vector<1x4xf32> -> vector<1x4xf32>
    %c1_137 = arith.constant 1 : index
    %c0_138 = arith.constant 0 : index
    %c0_139 = arith.constant 0 : index
    %238 = vector.load %arg21[%c1_137, %c0_138, %c0_139] : memref<5x1x4xf32, #tpu.memory_space<vmem>>, vector<1x1x4xf32>
    %239 = vector.shape_cast %238 : vector<1x1x4xf32> to vector<1x4xf32>
    %240 = arith.addf %237, %239 : vector<1x4xf32>
    %241 = vector.extract_strided_slice %240 {offsets = [0, 0], sizes = [1, 1], strides = [1, 1]} : vector<1x4xf32> to vector<1x1xf32>
    %cst_140 = arith.constant 0.000000e+00 : f32
    %242 = vector.broadcast %cst_140 : f32 to vector<1x1xf32>
    %243 = arith.subf %242, %241 : vector<1x1xf32>
    %244 = math.exp %243 : vector<1x1xf32>
    %cst_141 = arith.constant 1.000000e+00 : f32
    %245 = vector.broadcast %cst_141 : f32 to vector<1x1xf32>
    %246 = arith.addf %245, %244 : vector<1x1xf32>
    %cst_142 = arith.constant 1.000000e+00 : f32
    %247 = vector.broadcast %cst_142 : f32 to vector<1x1xf32>
    %248 = arith.divf %247, %246 : vector<1x1xf32>
    %c2_143 = arith.constant 2 : index
    %c0_144 = arith.constant 0 : index
    %c0_145 = arith.constant 0 : index
    %249 = vector.load %arg18[%c2_143, %c0_144, %c0_145] : memref<5x32x16xf32, #tpu.memory_space<vmem>>, vector<1x32x16xf32>
    %250 = vector.shape_cast %249 : vector<1x32x16xf32> to vector<32x16xf32>
    %cst_146 = arith.constant dense<0.000000e+00> : vector<1x16xf32>
    %251 = tpu.matmul %189, %250, %cst_146 {dimension_numbers = #tpu.dot_dimension_numbers<[1], [0], [0], [1], [0, 0, 1, 1], [], []>} : vector<1x32xf32>, vector<32x16xf32>, vector<1x16xf32> -> vector<1x16xf32>
    %c2_147 = arith.constant 2 : index
    %c0_148 = arith.constant 0 : index
    %c0_149 = arith.constant 0 : index
    %252 = vector.load %arg19[%c2_147, %c0_148, %c0_149] : memref<5x1x16xf32, #tpu.memory_space<vmem>>, vector<1x1x16xf32>
    %253 = vector.shape_cast %252 : vector<1x1x16xf32> to vector<1x16xf32>
    %254 = arith.addf %251, %253 : vector<1x16xf32>
    %cst_150 = arith.constant 0.000000e+00 : f32
    %255 = vector.broadcast %cst_150 : f32 to vector<1x16xf32>
    %256 = arith.maximumf %254, %255 : vector<1x16xf32>
    %c2_151 = arith.constant 2 : index
    %c0_152 = arith.constant 0 : index
    %c0_153 = arith.constant 0 : index
    %257 = vector.load %arg20[%c2_151, %c0_152, %c0_153] : memref<5x16x4xf32, #tpu.memory_space<vmem>>, vector<1x16x4xf32>
    %258 = vector.shape_cast %257 : vector<1x16x4xf32> to vector<16x4xf32>
    %cst_154 = arith.constant dense<0.000000e+00> : vector<1x4xf32>
    %259 = tpu.matmul %256, %258, %cst_154 {dimension_numbers = #tpu.dot_dimension_numbers<[1], [0], [0], [1], [0, 0, 1, 1], [], []>} : vector<1x16xf32>, vector<16x4xf32>, vector<1x4xf32> -> vector<1x4xf32>
    %c2_155 = arith.constant 2 : index
    %c0_156 = arith.constant 0 : index
    %c0_157 = arith.constant 0 : index
    %260 = vector.load %arg21[%c2_155, %c0_156, %c0_157] : memref<5x1x4xf32, #tpu.memory_space<vmem>>, vector<1x1x4xf32>
    %261 = vector.shape_cast %260 : vector<1x1x4xf32> to vector<1x4xf32>
    %262 = arith.addf %259, %261 : vector<1x4xf32>
    %263 = vector.extract_strided_slice %262 {offsets = [0, 0], sizes = [1, 3], strides = [1, 1]} : vector<1x4xf32> to vector<1x3xf32>
    %c3 = arith.constant 3 : index
    %c0_158 = arith.constant 0 : index
    %c0_159 = arith.constant 0 : index
    %264 = vector.load %arg18[%c3, %c0_158, %c0_159] : memref<5x32x16xf32, #tpu.memory_space<vmem>>, vector<1x32x16xf32>
    %265 = vector.shape_cast %264 : vector<1x32x16xf32> to vector<32x16xf32>
    %cst_160 = arith.constant dense<0.000000e+00> : vector<1x16xf32>
    %266 = tpu.matmul %204, %265, %cst_160 {dimension_numbers = #tpu.dot_dimension_numbers<[1], [0], [0], [1], [0, 0, 1, 1], [], []>} : vector<1x32xf32>, vector<32x16xf32>, vector<1x16xf32> -> vector<1x16xf32>
    %c3_161 = arith.constant 3 : index
    %c0_162 = arith.constant 0 : index
    %c0_163 = arith.constant 0 : index
    %267 = vector.load %arg19[%c3_161, %c0_162, %c0_163] : memref<5x1x16xf32, #tpu.memory_space<vmem>>, vector<1x1x16xf32>
    %268 = vector.shape_cast %267 : vector<1x1x16xf32> to vector<1x16xf32>
    %269 = arith.addf %266, %268 : vector<1x16xf32>
    %cst_164 = arith.constant 0.000000e+00 : f32
    %270 = vector.broadcast %cst_164 : f32 to vector<1x16xf32>
    %271 = arith.maximumf %269, %270 : vector<1x16xf32>
    %c3_165 = arith.constant 3 : index
    %c0_166 = arith.constant 0 : index
    %c0_167 = arith.constant 0 : index
    %272 = vector.load %arg20[%c3_165, %c0_166, %c0_167] : memref<5x16x4xf32, #tpu.memory_space<vmem>>, vector<1x16x4xf32>
    %273 = vector.shape_cast %272 : vector<1x16x4xf32> to vector<16x4xf32>
    %cst_168 = arith.constant dense<0.000000e+00> : vector<1x4xf32>
    %274 = tpu.matmul %271, %273, %cst_168 {dimension_numbers = #tpu.dot_dimension_numbers<[1], [0], [0], [1], [0, 0, 1, 1], [], []>} : vector<1x16xf32>, vector<16x4xf32>, vector<1x4xf32> -> vector<1x4xf32>
    %c3_169 = arith.constant 3 : index
    %c0_170 = arith.constant 0 : index
    %c0_171 = arith.constant 0 : index
    %275 = vector.load %arg21[%c3_169, %c0_170, %c0_171] : memref<5x1x4xf32, #tpu.memory_space<vmem>>, vector<1x1x4xf32>
    %276 = vector.shape_cast %275 : vector<1x1x4xf32> to vector<1x4xf32>
    %277 = arith.addf %274, %276 : vector<1x4xf32>
    %278 = vector.extract_strided_slice %277 {offsets = [0, 0], sizes = [1, 3], strides = [1, 1]} : vector<1x4xf32> to vector<1x3xf32>
    %c0_172 = arith.constant 0 : index
    %c0_173 = arith.constant 0 : index
    %c0_174 = arith.constant 0 : index
    %279 = vector.load %arg22[%c0_172, %c0_173, %c0_174] : memref<2x32x16xf32, #tpu.memory_space<vmem>>, vector<1x32x16xf32>
    %280 = vector.shape_cast %279 : vector<1x32x16xf32> to vector<32x16xf32>
    %cst_175 = arith.constant dense<0.000000e+00> : vector<1x16xf32>
    %281 = tpu.matmul %154, %280, %cst_175 {dimension_numbers = #tpu.dot_dimension_numbers<[1], [0], [0], [1], [0, 0, 1, 1], [], []>} : vector<1x32xf32>, vector<32x16xf32>, vector<1x16xf32> -> vector<1x16xf32>
    %c0_176 = arith.constant 0 : index
    %c0_177 = arith.constant 0 : index
    %c0_178 = arith.constant 0 : index
    %282 = vector.load %arg23[%c0_176, %c0_177, %c0_178] : memref<2x1x16xf32, #tpu.memory_space<vmem>>, vector<1x1x16xf32>
    %283 = vector.shape_cast %282 : vector<1x1x16xf32> to vector<1x16xf32>
    %284 = arith.addf %281, %283 : vector<1x16xf32>
    %cst_179 = arith.constant 0.000000e+00 : f32
    %285 = vector.broadcast %cst_179 : f32 to vector<1x16xf32>
    %286 = arith.maximumf %284, %285 : vector<1x16xf32>
    %c0_180 = arith.constant 0 : index
    %c0_181 = arith.constant 0 : index
    %c0_182 = arith.constant 0 : index
    %287 = vector.load %arg24[%c0_180, %c0_181, %c0_182] : memref<2x16x64xf32, #tpu.memory_space<vmem>>, vector<1x16x64xf32>
    %288 = vector.shape_cast %287 : vector<1x16x64xf32> to vector<16x64xf32>
    %cst_183 = arith.constant dense<0.000000e+00> : vector<1x64xf32>
    %289 = tpu.matmul %286, %288, %cst_183 {dimension_numbers = #tpu.dot_dimension_numbers<[1], [0], [0], [1], [0, 0, 1, 1], [], []>} : vector<1x16xf32>, vector<16x64xf32>, vector<1x64xf32> -> vector<1x64xf32>
    %c0_184 = arith.constant 0 : index
    %c0_185 = arith.constant 0 : index
    %c0_186 = arith.constant 0 : index
    %290 = vector.load %arg25[%c0_184, %c0_185, %c0_186] : memref<2x1x64xf32, #tpu.memory_space<vmem>>, vector<1x1x64xf32>
    %291 = vector.shape_cast %290 : vector<1x1x64xf32> to vector<1x64xf32>
    %292 = arith.addf %289, %291 : vector<1x64xf32>
    %cst_187 = arith.constant 0.000000e+00 : f32
    %293 = vector.broadcast %cst_187 : f32 to vector<1x64xf32>
    %294 = arith.maximumf %292, %293 : vector<1x64xf32>
    %c0_188 = arith.constant 0 : index
    %c0_189 = arith.constant 0 : index
    %c0_190 = arith.constant 0 : index
    %295 = vector.load %arg26[%c0_188, %c0_189, %c0_190] : memref<2x64x1xf32, #tpu.memory_space<vmem>>, vector<1x64x1xf32>
    %296 = vector.shape_cast %295 : vector<1x64x1xf32> to vector<64x1xf32>
    %cst_191 = arith.constant dense<0.000000e+00> : vector<1x1xf32>
    %297 = tpu.matmul %294, %296, %cst_191 {dimension_numbers = #tpu.dot_dimension_numbers<[1], [0], [0], [1], [0, 0, 1, 1], [], []>} : vector<1x64xf32>, vector<64x1xf32>, vector<1x1xf32> -> vector<1x1xf32>
    %c0_192 = arith.constant 0 : index
    %c0_193 = arith.constant 0 : index
    %c0_194 = arith.constant 0 : index
    %298 = vector.load %arg27[%c0_192, %c0_193, %c0_194] : memref<2x1x1xf32, #tpu.memory_space<vmem>>, vector<1x1x1xf32>
    %299 = vector.shape_cast %298 : vector<1x1x1xf32> to vector<1x1xf32>
    %300 = arith.addf %297, %299 : vector<1x1xf32>
    %cst_195 = arith.constant 0.000000e+00 : f32
    %301 = vector.broadcast %cst_195 : f32 to vector<1x1xf32>
    %302 = arith.subf %301, %300 : vector<1x1xf32>
    %303 = math.exp %302 : vector<1x1xf32>
    %cst_196 = arith.constant 1.000000e+00 : f32
    %304 = vector.broadcast %cst_196 : f32 to vector<1x1xf32>
    %305 = arith.addf %304, %303 : vector<1x1xf32>
    %cst_197 = arith.constant 1.000000e+00 : f32
    %306 = vector.broadcast %cst_197 : f32 to vector<1x1xf32>
    %307 = arith.divf %306, %305 : vector<1x1xf32>
    %c1_198 = arith.constant 1 : index
    %c0_199 = arith.constant 0 : index
    %c0_200 = arith.constant 0 : index
    %308 = vector.load %arg22[%c1_198, %c0_199, %c0_200] : memref<2x32x16xf32, #tpu.memory_space<vmem>>, vector<1x32x16xf32>
    %309 = vector.shape_cast %308 : vector<1x32x16xf32> to vector<32x16xf32>
    %cst_201 = arith.constant dense<0.000000e+00> : vector<1x16xf32>
    %310 = tpu.matmul %155, %309, %cst_201 {dimension_numbers = #tpu.dot_dimension_numbers<[1], [0], [0], [1], [0, 0, 1, 1], [], []>} : vector<1x32xf32>, vector<32x16xf32>, vector<1x16xf32> -> vector<1x16xf32>
    %c1_202 = arith.constant 1 : index
    %c0_203 = arith.constant 0 : index
    %c0_204 = arith.constant 0 : index
    %311 = vector.load %arg23[%c1_202, %c0_203, %c0_204] : memref<2x1x16xf32, #tpu.memory_space<vmem>>, vector<1x1x16xf32>
    %312 = vector.shape_cast %311 : vector<1x1x16xf32> to vector<1x16xf32>
    %313 = arith.addf %310, %312 : vector<1x16xf32>
    %cst_205 = arith.constant 0.000000e+00 : f32
    %314 = vector.broadcast %cst_205 : f32 to vector<1x16xf32>
    %315 = arith.maximumf %313, %314 : vector<1x16xf32>
    %c1_206 = arith.constant 1 : index
    %c0_207 = arith.constant 0 : index
    %c0_208 = arith.constant 0 : index
    %316 = vector.load %arg24[%c1_206, %c0_207, %c0_208] : memref<2x16x64xf32, #tpu.memory_space<vmem>>, vector<1x16x64xf32>
    %317 = vector.shape_cast %316 : vector<1x16x64xf32> to vector<16x64xf32>
    %cst_209 = arith.constant dense<0.000000e+00> : vector<1x64xf32>
    %318 = tpu.matmul %315, %317, %cst_209 {dimension_numbers = #tpu.dot_dimension_numbers<[1], [0], [0], [1], [0, 0, 1, 1], [], []>} : vector<1x16xf32>, vector<16x64xf32>, vector<1x64xf32> -> vector<1x64xf32>
    %c1_210 = arith.constant 1 : index
    %c0_211 = arith.constant 0 : index
    %c0_212 = arith.constant 0 : index
    %319 = vector.load %arg25[%c1_210, %c0_211, %c0_212] : memref<2x1x64xf32, #tpu.memory_space<vmem>>, vector<1x1x64xf32>
    %320 = vector.shape_cast %319 : vector<1x1x64xf32> to vector<1x64xf32>
    %321 = arith.addf %318, %320 : vector<1x64xf32>
    %cst_213 = arith.constant 0.000000e+00 : f32
    %322 = vector.broadcast %cst_213 : f32 to vector<1x64xf32>
    %323 = arith.maximumf %321, %322 : vector<1x64xf32>
    %c1_214 = arith.constant 1 : index
    %c0_215 = arith.constant 0 : index
    %c0_216 = arith.constant 0 : index
    %324 = vector.load %arg26[%c1_214, %c0_215, %c0_216] : memref<2x64x1xf32, #tpu.memory_space<vmem>>, vector<1x64x1xf32>
    %325 = vector.shape_cast %324 : vector<1x64x1xf32> to vector<64x1xf32>
    %cst_217 = arith.constant dense<0.000000e+00> : vector<1x1xf32>
    %326 = tpu.matmul %323, %325, %cst_217 {dimension_numbers = #tpu.dot_dimension_numbers<[1], [0], [0], [1], [0, 0, 1, 1], [], []>} : vector<1x64xf32>, vector<64x1xf32>, vector<1x1xf32> -> vector<1x1xf32>
    %c1_218 = arith.constant 1 : index
    %c0_219 = arith.constant 0 : index
    %c0_220 = arith.constant 0 : index
    %327 = vector.load %arg27[%c1_218, %c0_219, %c0_220] : memref<2x1x1xf32, #tpu.memory_space<vmem>>, vector<1x1x1xf32>
    %328 = vector.shape_cast %327 : vector<1x1x1xf32> to vector<1x1xf32>
    %329 = arith.addf %326, %328 : vector<1x1xf32>
    %cst_221 = arith.constant 0.000000e+00 : f32
    %330 = vector.broadcast %cst_221 : f32 to vector<1x1xf32>
    %331 = arith.subf %330, %329 : vector<1x1xf32>
    %332 = math.exp %331 : vector<1x1xf32>
    %cst_222 = arith.constant 1.000000e+00 : f32
    %333 = vector.broadcast %cst_222 : f32 to vector<1x1xf32>
    %334 = arith.addf %333, %332 : vector<1x1xf32>
    %cst_223 = arith.constant 1.000000e+00 : f32
    %335 = vector.broadcast %cst_223 : f32 to vector<1x1xf32>
    %336 = arith.divf %335, %334 : vector<1x1xf32>
    %337 = vector.broadcast %307 : vector<1x1xf32> to vector<1x32xf32>
    %338 = arith.mulf %337, %152 : vector<1x32xf32>
    %339 = vector.broadcast %336 : vector<1x1xf32> to vector<1x32xf32>
    %340 = arith.mulf %339, %153 : vector<1x32xf32>
    %341 = tpu.concatenate %174, %338, %340 in 0 : vector<1x32xf32>, vector<1x32xf32>, vector<1x32xf32> -> vector<3x32xf32>
    %c3_224 = arith.constant 3 : index
    %c0_225 = arith.constant 0 : index
    %342 = vector.load %arg16[%c3_224, %c0_225] : memref<4x32xf32, #tpu.memory_space<vmem>>, vector<1x32xf32>
    %c0_226 = arith.constant 0 : index
    %c3_227 = arith.constant 3 : index
    %343 = vector.load %arg17[%c0_226, %c3_227] : memref<1x4xf32, #tpu.memory_space<vmem>>, vector<1x1xf32>
    %cst_228 = arith.constant dense<0.000000e+00> : vector<1x3xf32>
    %344 = tpu.matmul %342, %341, %cst_228 {dimension_numbers = #tpu.dot_dimension_numbers<[1], [1], [0], [0], [0, 0, 1, 0], [], []>} : vector<1x32xf32>, vector<3x32xf32>, vector<1x3xf32> -> vector<1x3xf32>
    %345 = vector.broadcast %343 : vector<1x1xf32> to vector<1x3xf32>
    %346 = arith.addf %344, %345 : vector<1x3xf32>
    %cst_229 = arith.constant dense<0xFF800000> : vector<1xf32>
    %347 = vector.multi_reduction <maximumf>, %346, %cst_229 [1] : vector<1x3xf32> to vector<1xf32>
    %348 = vector.shape_cast %347 : vector<1xf32> to vector<1x1xf32>
    %349 = vector.broadcast %348 : vector<1x1xf32> to vector<1x3xf32>
    %350 = arith.subf %346, %349 : vector<1x3xf32>
    %351 = math.exp %350 : vector<1x3xf32>
    %cst_230 = arith.constant dense<0.000000e+00> : vector<1xf32>
    %352 = vector.multi_reduction <add>, %351, %cst_230 [1] : vector<1x3xf32> to vector<1xf32>
    %353 = vector.shape_cast %352 : vector<1xf32> to vector<1x1xf32>
    %354 = vector.broadcast %353 : vector<1x1xf32> to vector<1x3xf32>
    %355 = arith.divf %351, %354 : vector<1x3xf32>
    %cst_231 = arith.constant dense<0.000000e+00> : vector<1x32xf32>
    %356 = tpu.matmul %355, %341, %cst_231 {dimension_numbers = #tpu.dot_dimension_numbers<[1], [0], [0], [1], [0, 0, 1, 1], [], []>} : vector<1x3xf32>, vector<3x32xf32>, vector<1x32xf32> -> vector<1x32xf32>
    %c4 = arith.constant 4 : index
    %c0_232 = arith.constant 0 : index
    %c0_233 = arith.constant 0 : index
    %357 = vector.load %arg18[%c4, %c0_232, %c0_233] : memref<5x32x16xf32, #tpu.memory_space<vmem>>, vector<1x32x16xf32>
    %358 = vector.shape_cast %357 : vector<1x32x16xf32> to vector<32x16xf32>
    %cst_234 = arith.constant dense<0.000000e+00> : vector<1x16xf32>
    %359 = tpu.matmul %356, %358, %cst_234 {dimension_numbers = #tpu.dot_dimension_numbers<[1], [0], [0], [1], [0, 0, 1, 1], [], []>} : vector<1x32xf32>, vector<32x16xf32>, vector<1x16xf32> -> vector<1x16xf32>
    %c4_235 = arith.constant 4 : index
    %c0_236 = arith.constant 0 : index
    %c0_237 = arith.constant 0 : index
    %360 = vector.load %arg19[%c4_235, %c0_236, %c0_237] : memref<5x1x16xf32, #tpu.memory_space<vmem>>, vector<1x1x16xf32>
    %361 = vector.shape_cast %360 : vector<1x1x16xf32> to vector<1x16xf32>
    %362 = arith.addf %359, %361 : vector<1x16xf32>
    %cst_238 = arith.constant 0.000000e+00 : f32
    %363 = vector.broadcast %cst_238 : f32 to vector<1x16xf32>
    %364 = arith.maximumf %362, %363 : vector<1x16xf32>
    %c4_239 = arith.constant 4 : index
    %c0_240 = arith.constant 0 : index
    %c0_241 = arith.constant 0 : index
    %365 = vector.load %arg20[%c4_239, %c0_240, %c0_241] : memref<5x16x4xf32, #tpu.memory_space<vmem>>, vector<1x16x4xf32>
    %366 = vector.shape_cast %365 : vector<1x16x4xf32> to vector<16x4xf32>
    %cst_242 = arith.constant dense<0.000000e+00> : vector<1x4xf32>
    %367 = tpu.matmul %364, %366, %cst_242 {dimension_numbers = #tpu.dot_dimension_numbers<[1], [0], [0], [1], [0, 0, 1, 1], [], []>} : vector<1x16xf32>, vector<16x4xf32>, vector<1x4xf32> -> vector<1x4xf32>
    %c4_243 = arith.constant 4 : index
    %c0_244 = arith.constant 0 : index
    %c0_245 = arith.constant 0 : index
    %368 = vector.load %arg21[%c4_243, %c0_244, %c0_245] : memref<5x1x4xf32, #tpu.memory_space<vmem>>, vector<1x1x4xf32>
    %369 = vector.shape_cast %368 : vector<1x1x4xf32> to vector<1x4xf32>
    %370 = arith.addf %367, %369 : vector<1x4xf32>
    %371 = vector.extract_strided_slice %370 {offsets = [0, 0], sizes = [1, 1], strides = [1, 1]} : vector<1x4xf32> to vector<1x1xf32>
    %cst_246 = arith.constant 0.000000e+00 : f32
    %372 = vector.broadcast %cst_246 : f32 to vector<1x1xf32>
    %373 = arith.subf %372, %371 : vector<1x1xf32>
    %374 = math.exp %373 : vector<1x1xf32>
    %cst_247 = arith.constant 1.000000e+00 : f32
    %375 = vector.broadcast %cst_247 : f32 to vector<1x1xf32>
    %376 = arith.addf %375, %374 : vector<1x1xf32>
    %cst_248 = arith.constant 1.000000e+00 : f32
    %377 = vector.broadcast %cst_248 : f32 to vector<1x1xf32>
    %378 = arith.divf %377, %376 : vector<1x1xf32>
    %379 = tpu.concatenate %356, %174, %338, %340 in 1 : vector<1x32xf32>, vector<1x32xf32>, vector<1x32xf32>, vector<1x32xf32> -> vector<1x128xf32>
    %380 = vector.shape_cast %379 : vector<1x128xf32> to vector<1x1x128xf32>
    %c0_249 = arith.constant 0 : index
    %c0_250 = arith.constant 0 : index
    %c0_251 = arith.constant 0 : index
    %381 = vector.load %arg28[%c0_249, %c0_250, %c0_251] : memref<1x1x128xf32, #tpu.memory_space<vmem>>, vector<1x1x128xf32>
    tpu.vector_store %arg28[%c0_249, %c0_250, %c0_251], %380 {strides = array<i32>} : memref<1x1x128xf32, #tpu.memory_space<vmem>>, vector<1x1x128xf32>,
    %382 = tpu.concatenate %378, %226, %248, %307, %336, %263, %278 in 1 : vector<1x1xf32>, vector<1x1xf32>, vector<1x1xf32>, vector<1x1xf32>, vector<1x1xf32>, vector<1x3xf32>, vector<1x3xf32> -> vector<1x11xf32>
    %cst_252 = arith.constant 0.000000e+00 : f32
    %383 = vector.broadcast %cst_252 : f32 to vector<1x117xf32>
    %384 = tpu.concatenate %382, %383 in 1 : vector<1x11xf32>, vector<1x117xf32> -> vector<1x128xf32>
    %385 = vector.shape_cast %384 : vector<1x128xf32> to vector<1x1x128xf32>
    %c0_253 = arith.constant 0 : index
    %c0_254 = arith.constant 0 : index
    %c0_255 = arith.constant 0 : index
    %386 = vector.load %arg29[%c0_253, %c0_254, %c0_255] : memref<1x1x128xf32, #tpu.memory_space<vmem>>, vector<1x1x128xf32>
    tpu.vector_store %arg29[%c0_253, %c0_254, %c0_255], %385 {strides = array<i32>} : memref<1x1x128xf32, #tpu.memory_space<vmem>>, vector<1x1x128xf32>,
    return
  }
  func.func @transform_0(%arg0: i32) -> (i32, i32, i32) {
    %c0_i32 = arith.constant 0 : i32
    %c0_i32_0 = arith.constant 0 : i32
    %c0_i32_1 = arith.constant 0 : i32
    return %arg0, %c0_i32, %c0_i32_0 : i32, i32, i32
  }
  func.func @transform_1(%arg0: i32) -> (i32, i32, i32) {
    %c0_i32 = arith.constant 0 : i32
    %c0_i32_0 = arith.constant 0 : i32
    %c0_i32_1 = arith.constant 0 : i32
    return %arg0, %c0_i32, %c0_i32_0 : i32, i32, i32
  }
  func.func @transform_2(%arg0: i32) -> (i32, i32, i32) {
    %c0_i32 = arith.constant 0 : i32
    %c0_i32_0 = arith.constant 0 : i32
    %c0_i32_1 = arith.constant 0 : i32
    return %arg0, %c0_i32, %c0_i32_0 : i32, i32, i32
  }
  func.func @transform_3(%arg0: i32) -> (i32, i32, i32) {
    %c0_i32 = arith.constant 0 : i32
    %c0_i32_0 = arith.constant 0 : i32
    %c0_i32_1 = arith.constant 0 : i32
    return %arg0, %c0_i32, %c0_i32_0 : i32, i32, i32
  }
  func.func @transform_4(%arg0: i32) -> (i32, i32, i32) {
    %c0_i32 = arith.constant 0 : i32
    %c0_i32_0 = arith.constant 0 : i32
    %c0_i32_1 = arith.constant 0 : i32
    return %arg0, %c0_i32, %c0_i32_0 : i32, i32, i32
  }
  func.func @transform_5(%arg0: i32) -> (i32, i32, i32) {
    %c0_i32 = arith.constant 0 : i32
    %c0_i32_0 = arith.constant 0 : i32
    %c0_i32_1 = arith.constant 0 : i32
    %c0_i32_2 = arith.constant 0 : i32
    return %c0_i32, %c0_i32_0, %c0_i32_1 : i32, i32, i32
  }
  func.func @transform_6(%arg0: i32) -> (i32, i32, i32) {
    %c0_i32 = arith.constant 0 : i32
    %c0_i32_0 = arith.constant 0 : i32
    %c0_i32_1 = arith.constant 0 : i32
    %c0_i32_2 = arith.constant 0 : i32
    return %c0_i32, %c0_i32_0, %c0_i32_1 : i32, i32, i32
  }
  func.func @transform_7(%arg0: i32) -> (i32, i32) {
    %c0_i32 = arith.constant 0 : i32
    %c0_i32_0 = arith.constant 0 : i32
    %c0_i32_1 = arith.constant 0 : i32
    return %c0_i32, %c0_i32_0 : i32, i32
  }
  func.func @transform_8(%arg0: i32) -> (i32, i32) {
    %c0_i32 = arith.constant 0 : i32
    %c0_i32_0 = arith.constant 0 : i32
    %c0_i32_1 = arith.constant 0 : i32
    return %c0_i32, %c0_i32_0 : i32, i32
  }
  func.func @transform_9(%arg0: i32) -> (i32, i32) {
    %c0_i32 = arith.constant 0 : i32
    %c0_i32_0 = arith.constant 0 : i32
    %c0_i32_1 = arith.constant 0 : i32
    return %c0_i32, %c0_i32_0 : i32, i32
  }
  func.func @transform_10(%arg0: i32) -> (i32, i32) {
    %c0_i32 = arith.constant 0 : i32
    %c0_i32_0 = arith.constant 0 : i32
    %c0_i32_1 = arith.constant 0 : i32
    return %c0_i32, %c0_i32_0 : i32, i32
  }
  func.func @transform_11(%arg0: i32) -> (i32, i32) {
    %c0_i32 = arith.constant 0 : i32
    %c0_i32_0 = arith.constant 0 : i32
    %c0_i32_1 = arith.constant 0 : i32
    return %c0_i32, %c0_i32_0 : i32, i32
  }
  func.func @transform_12(%arg0: i32) -> (i32, i32) {
    %c0_i32 = arith.constant 0 : i32
    %c0_i32_0 = arith.constant 0 : i32
    %c0_i32_1 = arith.constant 0 : i32
    return %c0_i32, %c0_i32_0 : i32, i32
  }
  func.func @transform_13(%arg0: i32) -> (i32, i32) {
    %c0_i32 = arith.constant 0 : i32
    %c0_i32_0 = arith.constant 0 : i32
    %c0_i32_1 = arith.constant 0 : i32
    return %c0_i32, %c0_i32_0 : i32, i32
  }
  func.func @transform_14(%arg0: i32) -> (i32, i32) {
    %c0_i32 = arith.constant 0 : i32
    %c0_i32_0 = arith.constant 0 : i32
    %c0_i32_1 = arith.constant 0 : i32
    return %c0_i32, %c0_i32_0 : i32, i32
  }
  func.func @transform_15(%arg0: i32) -> (i32, i32) {
    %c0_i32 = arith.constant 0 : i32
    %c0_i32_0 = arith.constant 0 : i32
    %c0_i32_1 = arith.constant 0 : i32
    return %c0_i32, %c0_i32_0 : i32, i32
  }
  func.func @transform_16(%arg0: i32) -> (i32, i32) {
    %c0_i32 = arith.constant 0 : i32
    %c0_i32_0 = arith.constant 0 : i32
    %c0_i32_1 = arith.constant 0 : i32
    return %c0_i32, %c0_i32_0 : i32, i32
  }
  func.func @transform_17(%arg0: i32) -> (i32, i32, i32) {
    %c0_i32 = arith.constant 0 : i32
    %c0_i32_0 = arith.constant 0 : i32
    %c0_i32_1 = arith.constant 0 : i32
    %c0_i32_2 = arith.constant 0 : i32
    return %c0_i32, %c0_i32_0, %c0_i32_1 : i32, i32, i32
  }
  func.func @transform_18(%arg0: i32) -> (i32, i32, i32) {
    %c0_i32 = arith.constant 0 : i32
    %c0_i32_0 = arith.constant 0 : i32
    %c0_i32_1 = arith.constant 0 : i32
    %c0_i32_2 = arith.constant 0 : i32
    return %c0_i32, %c0_i32_0, %c0_i32_1 : i32, i32, i32
  }
  func.func @transform_19(%arg0: i32) -> (i32, i32, i32) {
    %c0_i32 = arith.constant 0 : i32
    %c0_i32_0 = arith.constant 0 : i32
    %c0_i32_1 = arith.constant 0 : i32
    %c0_i32_2 = arith.constant 0 : i32
    return %c0_i32, %c0_i32_0, %c0_i32_1 : i32, i32, i32
  }
  func.func @transform_20(%arg0: i32) -> (i32, i32, i32) {
    %c0_i32 = arith.constant 0 : i32
    %c0_i32_0 = arith.constant 0 : i32
    %c0_i32_1 = arith.constant 0 : i32
    %c0_i32_2 = arith.constant 0 : i32
    return %c0_i32, %c0_i32_0, %c0_i32_1 : i32, i32, i32
  }
  func.func @transform_21(%arg0: i32) -> (i32, i32, i32) {
    %c0_i32 = arith.constant 0 : i32
    %c0_i32_0 = arith.constant 0 : i32
    %c0_i32_1 = arith.constant 0 : i32
    %c0_i32_2 = arith.constant 0 : i32
    return %c0_i32, %c0_i32_0, %c0_i32_1 : i32, i32, i32
  }
  func.func @transform_22(%arg0: i32) -> (i32, i32, i32) {
    %c0_i32 = arith.constant 0 : i32
    %c0_i32_0 = arith.constant 0 : i32
    %c0_i32_1 = arith.constant 0 : i32
    %c0_i32_2 = arith.constant 0 : i32
    return %c0_i32, %c0_i32_0, %c0_i32_1 : i32, i32, i32
  }
  func.func @transform_23(%arg0: i32) -> (i32, i32, i32) {
    %c0_i32 = arith.constant 0 : i32
    %c0_i32_0 = arith.constant 0 : i32
    %c0_i32_1 = arith.constant 0 : i32
    %c0_i32_2 = arith.constant 0 : i32
    return %c0_i32, %c0_i32_0, %c0_i32_1 : i32, i32, i32
  }
  func.func @transform_24(%arg0: i32) -> (i32, i32, i32) {
    %c0_i32 = arith.constant 0 : i32
    %c0_i32_0 = arith.constant 0 : i32
    %c0_i32_1 = arith.constant 0 : i32
    %c0_i32_2 = arith.constant 0 : i32
    return %c0_i32, %c0_i32_0, %c0_i32_1 : i32, i32, i32
  }
  func.func @transform_25(%arg0: i32) -> (i32, i32, i32) {
    %c0_i32 = arith.constant 0 : i32
    %c0_i32_0 = arith.constant 0 : i32
    %c0_i32_1 = arith.constant 0 : i32
    %c0_i32_2 = arith.constant 0 : i32
    return %c0_i32, %c0_i32_0, %c0_i32_1 : i32, i32, i32
  }
  func.func @transform_26(%arg0: i32) -> (i32, i32, i32) {
    %c0_i32 = arith.constant 0 : i32
    %c0_i32_0 = arith.constant 0 : i32
    %c0_i32_1 = arith.constant 0 : i32
    %c0_i32_2 = arith.constant 0 : i32
    return %c0_i32, %c0_i32_0, %c0_i32_1 : i32, i32, i32
  }
  func.func @transform_27(%arg0: i32) -> (i32, i32, i32) {
    %c0_i32 = arith.constant 0 : i32
    %c0_i32_0 = arith.constant 0 : i32
    %c0_i32_1 = arith.constant 0 : i32
    return %arg0, %c0_i32, %c0_i32_0 : i32, i32, i32
  }
  func.func @transform_28(%arg0: i32) -> (i32, i32, i32) {
    %c0_i32 = arith.constant 0 : i32
    %c0_i32_0 = arith.constant 0 : i32
    %c0_i32_1 = arith.constant 0 : i32
    return %arg0, %c0_i32, %c0_i32_0 : i32, i32, i32
  }
}

</mosaic_0001>

<bundles_post_ra>
// kernel: arg_forward.1
= control target key start
LH: loop header
LB: loop body
LE: loop exit
PB: predicated region body
PF: predicated region fallthrough
CT: control target
= control target key end

     0   :  { %s3767_s0 = inlined_call_operand.vmem [shape: f32[2,16,32], index: 0, kind: input, shape index: {}]   ;;  %s3768_s1 = inlined_call_operand.vmem [shape: f32[2,16,32], index: 1, kind: input, shape index: {}]   ;;  %s3769_s2 = inlined_call_operand.vmem [shape: f32[2,1,16], index: 2, kind: input, shape index: {}]   ;;  %s3770_s3 = inlined_call_operand.vmem [shape: f32[2,1,8], index: 3, kind: input, shape index: {}]   ;;  %s3771_s4 = inlined_call_operand.vmem [shape: f32[2,1,8], index: 4, kind: input, shape index: {}]   ;;  %s3772_s5 = inlined_call_operand.vmem [shape: f32[2,32,32], index: 5, kind: input, shape index: {}]   ;;  %s3773_s6 = inlined_call_operand.vmem [shape: f32[2,1,32], index: 6, kind: input, shape index: {}]   ;;  %s3774_s7 = inlined_call_operand.vmem [shape: f32[32,192], index: 7, kind: input, shape index: {}]   ;;  %s3775_s8 = inlined_call_operand.vmem [shape: f32[1,192], index: 8, kind: input, shape index: {}]   ;;  %s3776_s9 = inlined_call_operand.vmem [shape: f32[32,96], index: 9, kind: input, shape index: {}]   ;;  %s3777_s10 = inlined_call_operand.vmem [shape: f32[1,96], index: 10, kind: input, shape index: {}]   ;;  %s3778_s11 = inlined_call_operand.vmem [shape: f32[32,96], index: 11, kind: input, shape index: {}]   ;;  %s3779_s12 = inlined_call_operand.vmem [shape: f32[1,96], index: 12, kind: input, shape index: {}]   ;;  %s3780_s13 = inlined_call_operand.vmem [shape: f32[128,128], index: 13, kind: input, shape index: {}]   ;;  %s3781_s14 = inlined_call_operand.vmem [shape: f32[1,128], index: 14, kind: input, shape index: {}]   ;;  %s3782_s15 = inlined_call_operand.vmem [shape: f32[4,32], index: 15, kind: input, shape index: {}]   ;;  %s3783_s16 = inlined_call_operand.vmem [shape: f32[1,4], index: 16, kind: input, shape index: {}]   ;;  %s3784_s17 = inlined_call_operand.vmem [shape: f32[5,32,16], index: 17, kind: input, shape index: {}]   ;;  %s3785_s18 = inlined_call_operand.vmem [shape: f32[5,1,16], index: 18, kind: input, shape index: {}]   ;;  %s3786_s19 = inlined_call_operand.vmem [shape: f32[5,16,4], index: 19, kind: input, shape index: {}]   ;;  %s3787_s20 = inlined_call_operand.vmem [shape: f32[5,1,4], index: 20, kind: input, shape index: {}]   ;;  %s3788_s21 = inlined_call_operand.vmem [shape: f32[2,32,16], index: 21, kind: input, shape index: {}]   ;;  %s3789_s22 = inlined_call_operand.vmem [shape: f32[2,1,16], index: 22, kind: input, shape index: {}]   ;;  %s3790_s23 = inlined_call_operand.vmem [shape: f32[2,16,64], index: 23, kind: input, shape index: {}]   ;;  %s3791_s24 = inlined_call_operand.vmem [shape: f32[2,1,64], index: 24, kind: input, shape index: {}]   ;;  %s3792_s25 = inlined_call_operand.vmem [shape: f32[2,64,1], index: 25, kind: input, shape index: {}]   ;;  %s3793_s26 = inlined_call_operand.vmem [shape: f32[2,1,1], index: 26, kind: input, shape index: {}]   ;;  %s3794_s27 = inlined_call_operand.vmem [shape: f32[2,1,128], index: 27, kind: output, shape index: {0}]   ;;  %s3795_s28 = inlined_call_operand.vmem [shape: f32[2,1,128], index: 28, kind: output, shape index: {1}]  }
   0x1   :  { %3810 = sst [smem:[#allocation3_spill]] %s3767_s0 }
   0x2   :  { %3811 = sst [smem:[#allocation4_spill]] %s3768_s1 }
   0x3   :  { %3812 = sst [smem:[#allocation5_spill]] %s3769_s2 }
   0x4   :  { %3813 = sst [smem:[#allocation6_spill]] %s3770_s3 }
   0x5   :  { %3814 = sst [smem:[#allocation7_spill]] %s3771_s4 }
   0x6   :  { %3815 = sst [smem:[#allocation8_spill]] %s3772_s5 }
   0x7   :  { %3816 = sst [smem:[#allocation9_spill]] %s3773_s6 }
   0x8   :  { %3817 = sst [smem:[#allocation10_spill]] %s3774_s7 }
   0x9   :  { %3818 = sst [smem:[#allocation11_spill]] %s3775_s8  ;;  %s3114_s8 = smov 0  }
   0xa   :  { %3819 = sst [smem:[#allocation12_spill]] %s3776_s9 }
   0xb   :  { %3820 = sst [smem:[#allocation13_spill]] %s3777_s10 }
   0xc   :  { %3821 = sst [smem:[#allocation14_spill]] %s3778_s11 }
   0xd   :  { %3822 = sst [smem:[#allocation15_spill]] %s3779_s12 }
   0xe LB: > { %3823 = sst [smem:[#allocation2_spill]] %s2952_s8  ;;  %s2707_s5 = sadd.s32 4294967295, %s2952_s8   ;;  %s2952_s8 = sphi %s3114_s8, %s39_s8  }
   0xf   : > { %p2711_p0 = scmp.ge.s32.totalorder %s2952_s8, 1  ;;  %p799_p1 = scmp.lt.s32.totalorder %s2952_s8, 3 }
  0x11   : > { %p800_p2 = pnand %p2711_p0, %p799_p1 }
  0x12   : > { %s3824_s3 = sld [smem:[#allocation8_spill]] (!%p800_p2)  ;;  %p888_p3 = scmp.lt.s32.totalorder (!%p800_p2), %s2707_s5, 1 }
  0x13   : > { %803 = sbr.rel (%p800_p2) target bundleno = 3380 (0xd34), region = 128  ;;  %s3825_s2 = sld [smem:[#allocation3_spill]] (!%p800_p2) }
  0x14   : > { %s3826_s4 = sld [smem:[#allocation4_spill]] (!%p800_p2)  ;;  %s3805_s1 = smov (!%p800_p2), 96  }
  0x15   : > { %s3827_s6 = sld [smem:[#allocation10_spill]] (!%p800_p2)  ;;  %s3803_s30 = smov (!%p800_p2), 64  }
  0x16   : > { %s3828_s11 = sld [smem:[#allocation12_spill]] (!%p800_p2) }
  0x17   : > { %s3831_s10 = sld [smem:[#allocation9_spill]] (!%p800_p2) }
  0x18   : > { %v923_v0 = vld [vmem:[%s3824_s3 + $0x18] sm:$0xff]  ;;  %v922_v2 = vld [vmem:[%s3824_s3 + $0x10] sm:$0xff]  ;;  %v921_v4 = vld [vmem:[%s3824_s3 + $0x8] sm:$0xff]  ;;  %s3845_s5 = smov (!%p888_p3, %s2707_s5), 1  ;;  %vm928_vm0 = vcmask 261120   ;;  %s3833_s9 = sld [smem:[#allocation11_spill]] }
  0x19   : > { %v2721_v1 = vld [vmem:[%s3824_s3 + $0x38] sm:$0xff]  ;;  %947 = vmatpush.msra.mxu0 %v923_v0  ;;  %v2720_v3 = vld [vmem:[%s3824_s3 + $0x30] sm:$0xff]  ;;  %v2719_v5 = vld [vmem:[%s3824_s3 + $0x28] sm:$0xff]  ;;  %s2828_s0 = sshll.u32 %s3845_s5, 4  ;;  %v2956_v58 = vmov 0   ;;  %vm1164_vm3 = vcmask 130048  }
  0x1a   : > { %988 = vmatpush.msra.mxu1 %v2721_v1  ;;  %v920_v6 = vld [vmem:[%s3824_s3] sm:$0xff]  ;;  %s892_s7 = scalar_lea.vmem %s3825_s2, %s2828_s0  ;;  %s897_s8 = scalar_lea.vmem %s3826_s4, %s2828_s0  ;;  %2858 = vset.pattern.permute.xlu1 %v2956_v58  ;;  %vm1368_vm6 = vcmask 64512  }
  0x1b   : > { %948 = vmatpush.msra.mxu0 %v922_v2  ;;  %v2718_v7 = vld [vmem:[%s3824_s3 + $0x20] sm:$0xff]  ;;  %v914_v10 = vld [vmem:[%s892_s7 + $0x8] sm:$0xff]  ;;  %v1007_v12 = vld [vmem:[%s3827_s6 + $0x30] sm:$0xff]  ;;  %s3834_s2 = sld [smem:[#allocation15_spill]]  ;;  %2867 = vset.pattern.permute.xlu0 %v2956_v58 }
  0x1c   : > { %989 = vmatpush.msra.mxu1 %v2720_v3  ;;  %v913_v8 = vld [vmem:[%s892_s7] sm:$0xff]  ;;  %v916_v11 = vld [vmem:[%s897_s8 + $0x8] sm:$0xff]  ;;  %v1070_v13 = vld [vmem:[%s3828_s11 + $0x18] sm:$0xff]  ;;  %1033 = vmatpush.msra.mxu2 %v1007_v12  ;;  %s3835_s3 = sld [smem:[#allocation5_spill]]  ;;  %s3806_s7 = smov 32  }
  0x1d   : > { %949 = vmatpush.msra.mxu0 %v921_v4  ;;  %v915_v9 = vld [vmem:[%s897_s8] sm:$0xff]  ;;  %v1069_v15 = vld [vmem:[%s3828_s11 + $0x10] sm:$0xff]  ;;  %v1068_v17 = vld [vmem:[%s3828_s11 + $0x8] sm:$0xff]  ;;  %s3829_s8 = sld [smem:[#allocation14_spill]] }
  0x1e   : > { %990 = vmatpush.msra.mxu1 %v2719_v5  ;;  %v1005_v14 = vld [vmem:[%s3827_s6 + $0x20] sm:$0xff]  ;;  %v1003_v16 = vld [vmem:[%s3827_s6 + $0x10] sm:$0xff]  ;;  %v1008_v21 = vld [vmem:[%s3827_s6 + $0x38] sm:$0xff]  ;;  %s3838_s29 = sld [smem:[#allocation6_spill]] }
  0x1f   : > { %950 = vmatpush.msra.mxu0 %v920_v6  ;;  %1034 = vmatpush.msra.mxu2 %v1005_v14  ;;  %v1001_v18 = vld [vmem:[%s3827_s6] sm:$0xff]  ;;  %v1006_v23 = vld [vmem:[%s3827_s6 + $0x28] sm:$0xff]  ;;  %v1004_v25 = vld [vmem:[%s3827_s6 + $0x18] sm:$0xff] }
  0x20   : > { %991 = vmatpush.msra.mxu1 %v2718_v7  ;;  %2716 = vmatmul.msk.f32.vlgmr.msra.gmra.mxu0 %vm928_vm0, %v913_v8  ;;  %v1067_v19 = vld [vmem:[%s3828_s11] sm:$0xff]  ;;  %v1002_v27 = vld [vmem:[%s3827_s6 + $0x8] sm:$0xff]  ;;  %s2967_s6 = smov 5  }
  0x21   : > { %2723 = vmatmul.msk.f32.vlgmr.msra.gmra.mxu1 %vm928_vm0, %v915_v9  ;;  %1090 = vmatpush.msrb.mxu0 %v1070_v13  ;;  %v2869_v28 = vld [vmem:[%s3831_s10] ss:$0 sm:$0xff]  ;;  %v2870_v29 = vld [vmem:[%s3831_s10 + $0x1] ss:$0 sm:$0xff] }
  0x22   : > { %1035 = vmatpush.msra.mxu2 %v1003_v16  ;;  %1056 = vmatpush.msra.mxu3 %v1008_v21  ;;  %v1009_v46 = vld [vmem:[%s3833_s9] sm:$0x3]  ;;  %s900_s4 = scalar_lea.vmem %s3835_s3, %s3845_s5  ;;  %s3839_s9 = sld [smem:[#allocation7_spill]] }
  0x23   : > { %1091 = vmatpush.msrb.mxu0 %v1069_v15  ;;  %s3830_s12 = smov %s3829_s8  ;;  %v1101_v20 = vld [vmem:[%s3829_s8 + $0x18] sm:$0xff]  ;;  %s3832_s8 = sld [smem:[#allocation13_spill]]  ;;  %v1011_v47 = vperm.slane %v1009_v46, 0  ;;  %v2872_v51 = vld [vmem:[%s3834_s2] ss:$0 sm:$0xff]  ;;  %v1012_v54 = vperm.slane %v1009_v46, 1 }
  0x24   : > { %1036 = vmatpush.msra.mxu2 %v1001_v18  ;;  %v1100_v22 = vld [vmem:[%s3830_s12 + $0x10] sm:$0xff]  ;;  %1121 = vmatpush.msrb.mxu1 %v1101_v20  ;;  %v1099_v24 = vld [vmem:[%s3830_s12 + $0x8] sm:$0xff]  ;;  %v1098_v26 = vld [vmem:[%s3830_s12] sm:$0xff]  ;;  %s903_s2 = scalar_lea.vmem %s3838_s29, %s3845_s5  ;;  %s3841_s3 = smov 64  }
  0x25   : > { %1092 = vmatpush.msrb.mxu0 %v1068_v17  ;;  %1057 = vmatpush.msra.mxu3 %v1006_v23  ;;  %v3273_v62 = vld [vmem:[%s900_s4] sm:$0x1]  ;;  %s2965_s4 = smov 3  }
  0x26   : > { %1122 = vmatpush.msrb.mxu1 %v1100_v22  ;;  %vm1159_vm1 = vcmp.eq.f32.partialorder %v3273_v62, 0.0  ;;  %v918_v6 = vld [vmem:[%s903_s2] sm:$0x1]  ;;  %s2963_s2 = smov 1  }
  0x27   : > { %1093 = vmatpush.msrb.mxu0 %v1067_v19  ;;  %1058 = vmatpush.msra.mxu3 %v1004_v25  ;;  %v1160_v63 = vsel %vm1159_vm1, 1, %v2956_v58  ;;  %vm1362_vm4 = vcmp.eq.f32.partialorder %v918_v6, 0.0 }
  0x28   : > { %2717 = vmatmul.msk.f32.gmra.mxu0 %vm928_vm0, %v914_v10  ;;  %1123 = vmatpush.msrb.mxu1 %v1099_v24  ;;  %v1161_v0 = vperm.slane %v1160_v63, 0  ;;  %v1363_v7 = vsel %vm1362_vm4, 1, %v2956_v58  ;;  %s906_s0 = scalar_lea.vmem %s3839_s9, %s3845_s5  ;;  %s909_s9 = scalar_lea.vmem %s3794_s27, %s3845_s5 }
  0x29   : > { %2724 = vmatmul.msk.f32.gmra.mxu1 %vm928_vm0, %v916_v11  ;;  %1059 = vmatpush.msra.mxu3 %v1002_v27  ;;  %v2871_v42 = vld [vmem:[%s3832_s8] ss:$0 sm:$0xff]  ;;  %v1364_v8 = vperm.slane %v1363_v7, 0  ;;  %s2964_s8 = smov 2  }
  0x2a   : > { %1124 = vmatpush.msrb.mxu1 %v1098_v26  ;;  %vm3279_vm2 = vcmp.eq.s32.totalorder %v1161_v0, 1 }
  0x2b   : > { %vm1365_vm5 = vcmp.eq.s32.totalorder %v1364_v8, 1  ;;  %v2958_v8 = vmov 16.0  }
  0x9d   : > { %v952_v30 = vpop.f32.mrf.mxu0 }
  0x9e   : > { %v993_v31 = vpop.f32.mrf.mxu1  ;;  %v953_v32 = vadd.f32 %v2869_v28, %v952_v30 }
  0x9f   : > { %v994_v33 = vadd.f32 %v2870_v29, %v993_v31 }
  0xa0   : > { %2873 = vtanh.f32 %v953_v32 }
  0xa1   : > { %2875 = vtanh.f32 %v994_v33 }
  0xa5   : > { %v955_v34 = vpop.f32.mrf.mxu0 }
  0xa6   : > { %v996_v35 = vpop.f32.mrf.mxu1  ;;  %v3213_v36 = vpop.eup %2873  ;;  %v956_v37 = vadd.f32 %v2869_v28, %v955_v34 }
  0xa7   : > { %v997_v38 = vadd.f32 %v2870_v29, %v996_v35  ;;  %v3215_v39 = vpop.eup %2875  ;;  %2725 = vmatmul.msk.f32.vlgmr.msra.gmra.mxu2 %vm928_vm0, %v3213_v36  ;;  %2727 = vmatmul.msk.f32.vlgmr.msra.gmra.mxu3 %vm928_vm0, %v3213_v36 }
  0xa8   : > { %2877 = vtanh.f32 %v956_v37  ;;  %2729 = vmatmul.msk.f32.vlgmr.msrb.gmra.mxu0 %vm928_vm0, %v3215_v39 }
  0xa9   : > { %2879 = vtanh.f32 %v997_v38 }
  0xae   : > { %v3223_v40 = vpop.eup %2877 }
  0xaf   : > { %v3225_v41 = vpop.eup %2879  ;;  %2726 = vmatmul.msk.f32.gmra.mxu2 %vm928_vm0, %v3223_v40  ;;  %2728 = vmatmul.msk.f32.gmra.mxu3 %vm928_vm0, %v3223_v40 }
  0xb0   : > { %2730 = vmatmul.msk.f32.vlgmr.msrb.gmra.mxu1 %vm928_vm0, %v3225_v41 }
 0x125   : > { %v1095_v43 = vpop.f32.mrf.mxu0 }
 0x126   : > { %v3236_v44 = vadd.f32 %v2871_v42, %v1095_v43  ;;  %v3323_v42 = vld [vmem:[%s3783_s16] sm:$0x1] }
 0x128   : > { %1327 = vrot.lane.b32.xlu0 %v3236_v44, %s3805_s1 }
 0x12a   : > { %v1038_v45 = vpop.f32.mrf.mxu2  ;;  %v1061_v55 = vpop.f32.mrf.mxu3 }
 0x12b   : > { %v3245_v50 = vadd.f32 %v1038_v45, %v1011_v47  ;;  %v1062_v56 = vadd.f32 %v1061_v55, %v1012_v54 }
 0x12d   : > { %v1126_v52 = vpop.f32.mrf.mxu1 }
 0x12e   : > { %v3256_v53 = vadd.f32 %v2872_v51, %v1126_v52 }
 0x132   : > { %v1041_v48 = vpop.f32.mrf.mxu2  ;;  %v1064_v59 = vpop.f32.mrf.mxu3 }
 0x133   : > { %v3243_v49 = vadd.f32 %v1041_v48, %v1011_v47  ;;  %v1065_v60 = vadd.f32 %v1064_v59, %v1012_v54 }
 0x135   : > { %2731 = vmatpush.xpose.msk.msrb.mxu2 %vm928_vm0, %v3243_v49  ;;  %1235 = vrot.lane.b32.xlu2 %v3243_v49, %s3803_s30  ;;  %v3315_v35 = vpack.i.bf16 %v3245_v50, %v3243_v49 }
 0x139   : > { %2732 = vmatpush.xpose.msk.msrb.mxu2 %vm928_vm0, %v3245_v50 }
 0x13c   : > { %2733 = vmatmul.msk.f32.vlgmr.msrb.gmra.mxu2 %vm928_vm0, %v3236_v44 }
 0x13d   : > { %1464 = vrot.lane.b32.xlu2 %v3256_v53, %s3805_s1 }
 0x145   : > { %1460 = vrot.lane.b32.xlu2 %v1062_v56, %s3805_s1 }
 0x18f   : > { %v1236_v61 = vpop.permute.xlu2 %1235 }
 0x190   : > { %2735 = vmatpush.xpose.msk.msra.mxu0 %vm928_vm0, %v1236_v61  ;;  %v2957_v61 = vmov 8.0  }
 0x197   : > { %v1465_v33 = vpop.permute.xlu2 %1464 }
 0x19a   : > { %v1328_v57 = vpop.permute.xlu0 %1327 }
 0x19b   : > { %2739 = vmatpush.xpose.msk.msra.mxu2 %vm928_vm0, %v1328_v57 }
 0x19e   : > { %2740 = vmatmul.msk.f32.vlgmr.msra.gmra.mxu2 %vm928_vm0, %v1062_v56 }
 0x19f   : > { %v1461_v34 = vpop.permute.xlu2 %1460 }
 0x1a6   : > { %2741 = vmatmul.msk.f32.gmra.mxu2 %vm928_vm0, %v1065_v60 }
 0x1bf   : > { %v1155_v1 = vpop.f32.mrf.mxu2 }
 0x1c0   : > { %v1158_v3 = vmul.f32 0.17677669, %v1155_v1 }
 0x1c2   : > { %v1163_v4 = vsel %vm3279_vm2, -1e+09, %v1158_v3 }
 0x1c3   : > { %v1165_v5 = vsel %vm1164_vm3, %v1163_v4, -inf }
 0x1c4   : > { %1166 = vmax.xlane.f32.xlu0 %v1165_v5 }
 0x1d8   : > { %1462 = vrot.lane.b32.xlu0 %v1065_v60, %s3805_s1 }
 0x221   : > { %v1354_v9 = vpop.f32.mrf.mxu2 }
 0x222   : > { %v1360_v10 = vmul.f32 0.17677669, %v1354_v9 }
 0x224   : > { %v1366_v11 = vsel %vm1365_vm5, -1e+09, %v1360_v10 }
 0x225   : > { %v1369_v12 = vsel %vm1368_vm6, %v1366_v11, -inf }
 0x226   : > { %1370 = vmax.xlane.f32.xlu1 %v1369_v12 }
 0x229   : > { %v1357_v13 = vpop.f32.mrf.mxu2 }
 0x22a   : > { %v1361_v14 = vmul.f32 0.17677669, %v1357_v13 }
 0x22c   : > { %v1367_v15 = vsel %vm1365_vm5, -1e+09, %v1361_v14 }
 0x22d   : > { %v1372_v16 = vsel %vm1368_vm6, %v1367_v15, -inf }
 0x22e   : > { %1373 = vmax.xlane.f32.xlu1 %v1372_v16 }
 0x237   : > { %v1167_v17 = vpop.xlane.xlu0 %1166 }
 0x238   : > { %v1168_v18 = vsub.f32 %v1163_v4, %v1167_v17 }
 0x23a   : > { %v1169_v19 = vmul.f32 1.442695, %v1168_v18 }
 0x23c   : > { %2881 = vpow2.f32 %v1169_v19 }
 0x242   : > { %v2882_v20 = vpop.eup %2881 }
 0x243   : > { %v1171_v21 = vsel %vm1164_vm3, %v2882_v20, 0.0 }
 0x244   : > { %1172 = vadd.xlane.f32.xlu2 %v1171_v21 }
 0x247   : > { %1233 = vrot.lane.b32.xlu1 %v3245_v50, %s3803_s30 }
 0x24a   : > { %v1463_v37 = vpop.permute.xlu0 %1462 }
 0x299   : > { %v1371_v22 = vpop.xlane.xlu1 %1370 }
 0x29a   : > { %v1375_v23 = vsub.f32 %v1366_v11, %v1371_v22 }
 0x29c   : > { %v1377_v24 = vmul.f32 1.442695, %v1375_v23 }
 0x29e   : > { %2883 = vpow2.f32 %v1377_v24 }
 0x2a1   : > { %v1374_v25 = vpop.xlane.xlu1 %1373 }
 0x2a2   : > { %v1376_v26 = vsub.f32 %v1367_v15, %v1374_v25 }
 0x2a4   : > { %v3297_v27 = vpop.eup %2883  ;;  %v1379_v28 = vmul.f32 1.442695, %v1376_v26 }
 0x2a5   : > { %v1381_v29 = vsel %vm1368_vm6, %v3297_v27, 0.0 }
 0x2a6   : > { %2885 = vpow2.f32 %v1379_v28  ;;  %1382 = vadd.xlane.f32.xlu2 %v1381_v29 }
 0x2ac   : > { %v3301_v30 = vpop.eup %2885 }
 0x2ad   : > { %v1384_v31 = vsel %vm1368_vm6, %v3301_v30, 0.0 }
 0x2ae   : > { %1385 = vadd.xlane.f32.xlu1 %v1384_v31 }
 0x2b7   : > { %v1173_v38 = vpop.xlane.xlu2 %1172 }
 0x2b8   : > { %2887 = vrcp.f32 %v1173_v38  ;;  %v1185_v48 = vand.u32 2147483648, %v1173_v38  ;;  %vm1179_vm8 = vweird.f32 %v1173_v38  ;;  %v1183_v49 = vand.u32 2147483647, %v1173_v38 }
 0x2b9   : > { %v1234_v32 = vpop.permute.xlu1 %1233 }
 0x2ba   : > { %2736 = vmatpush.xpose.msk.msra.mxu0 %vm928_vm0, %v1234_v32  ;;  %v1186_v51 = vor.u32 1.1754944e-38, %v1185_v48  ;;  %vm1184_vm10 = vcmp.eq.f32.partialorder %v1183_v49, 8.507059e+37 }
 0x2bd   : > { %2737 = vmatmul.msk.f32.vlgmr.msra.gmra.mxu0 %vm928_vm0, %v3256_v53 }
 0x2be   : > { %2743 = vmatpush.xpose.msk.msrb.mxu0 %vm928_vm0, %v1465_v33  ;;  %1434 = vrot.lane.b32.xlu2 %v3236_v44, %s3803_s30  ;;  %v2888_v43 = vpop.eup %2887 }
 0x2bf   : > { %v1175_v44 = vmul.f32 %v2888_v43, %v1173_v38  ;;  %vm1180_vm7 = vweird.f32 %v2888_v43  ;;  %v919_v38 = vld [vmem:[%s906_s0] sm:$0x1] }
 0x2c0   : > { %vm1181_vm9 = vmor %vm1179_vm8, %vm1180_vm7 }
 0x2c1   : > { %v1176_v45 = vsub.f32 1.0, %v1175_v44 }
 0x2c2   : > { %1793 = vmatpush.msra.mxu0 %v3215_v39 }
 0x2c3   : > { %v1177_v46 = vmul.f32 %v2888_v43, %v1176_v45 }
 0x2c5   : > { %2744 = vmatmul.msk.f32.vlgmr.msrb.gmra.mxu0 %vm928_vm0, %v1461_v34  ;;  %v1178_v47 = vadd.f32 %v2888_v43, %v1177_v46 }
 0x2c7   : > { %2854 = vrot.lane.b32.xlu1 %v3315_v35, %s3805_s1  ;;  %v1182_v50 = vsel %vm1181_vm9, %v2888_v43, %v1178_v47  ;;  %vm1497_vm9 = vcmp.eq.f32.partialorder %v919_v38, 0.0 }
 0x2c8   : > { %v1187_v54 = vsel %vm1184_vm10, %v1186_v51, %v1182_v50 }
 0x2c9   : > { %v1188_v55 = vmul.f32 %v2882_v20, %v1187_v54  ;;  %v1498_v54 = vsel %vm1497_vm9, 1, %v2956_v58 }
 0x2cb   : > { %v1189_v57 = vsel %vm1164_vm3, %v1188_v55, 0.0 }
 0x2cc   : > { %v1190_v0 = vrot.slane %v1189_v57, 4 }
 0x2cd   : > { %2745 = vmatmul.msk.f32.gmra.mxu0 %vm928_vm0, %v1463_v37 }
 0x2ce   : > { %v1191_v7 = vadd.f32 %v1190_v0, %v1189_v57 }
 0x2cf   : > { %1645 = vperm.xlu1 %2858, %v3323_v42  }
 0x2d0   : > { %v1192_v16 = vrot.slane %v1191_v7, 2 }
 0x2d2   : > { %v1193_v24 = vadd.f32 %v1192_v16, %v1191_v7 }
 0x2d4   : > { %v1194_v37 = vrot.slane %v1193_v24, 1 }
 0x2d6   : > { %v1195_v47 = vadd.f32 %v1194_v37, %v1193_v24 }
 0x319   : > { %v1383_v52 = vpop.xlane.xlu2 %1382 }
 0x31a   : > { %2889 = vrcp.f32 %v1383_v52  ;;  %v1398_v6 = vand.u32 2147483648, %v1383_v52  ;;  %vm1392_vm12 = vweird.f32 %v1383_v52  ;;  %v1396_v9 = vand.u32 2147483647, %v1383_v52 }
 0x31b   : > { %2891 = vrcp.f32 %v2957_v61 }
 0x31c   : > { %v1399_v14 = vor.u32 1.1754944e-38, %v1398_v6  ;;  %vm1397_vm14 = vcmp.eq.f32.partialorder %v1396_v9, 8.507059e+37 }
 0x320   : > { %v2890_v56 = vpop.eup %2889 }
 0x321   : > { %v1388_v59 = vmul.f32 %v2890_v56, %v1383_v52  ;;  %v1386_v60 = vpop.xlane.xlu1 %1385  ;;  %v2892_v3 = vpop.eup %2891  ;;  %vm1393_vm11 = vweird.f32 %v2890_v56 }
 0x322   : > { %2893 = vrcp.f32 %v1386_v60  ;;  %vm1394_vm13 = vmor %vm1392_vm12, %vm1393_vm11  ;;  %v1197_v11 = vmul.f32 8.0, %v2892_v3  ;;  %v1413_v15 = vand.u32 2147483648, %v1386_v60  ;;  %v1411_v18 = vand.u32 2147483647, %v1386_v60 }
 0x323   : > { %v1389_v63 = vsub.f32 1.0, %v1388_v59  ;;  %2895 = vrcp.f32 %v2958_v8  ;;  %vm1407_vm4 = vweird.f32 %v1386_v60  ;;  %vm1201_vm8 = vweird.f32 %v2892_v3 }
 0x324   : > { %v1198_v21 = vsub.f32 1.0, %v1197_v11  ;;  %v1414_v23 = vor.u32 1.1754944e-38, %v1413_v15  ;;  %vm1412_vm7 = vcmp.eq.f32.partialorder %v1411_v18, 8.507059e+37  ;;  %vm1673_vm11 = vcmask 122880  }
 0x325   : > { %v1390_v1 = vmul.f32 %v2890_v56, %v1389_v63  ;;  %v1499_v63 = vperm.slane %v1498_v54, 0 }
 0x326   : > { %v1199_v31 = vmul.f32 %v2892_v3, %v1198_v21 }
 0x327   : > { %v1391_v4 = vadd.f32 %v2890_v56, %v1390_v1  ;;  %v1435_v1 = vpop.permute.xlu2 %1434 }
 0x328   : > { %v2894_v5 = vpop.eup %2893 }
 0x329   : > { %v1403_v10 = vmul.f32 %v2894_v5, %v1386_v60  ;;  %v1395_v12 = vsel %vm1394_vm13, %v2890_v56, %v1391_v4  ;;  %vm1408_vm15 = vweird.f32 %v2894_v5  ;;  %v2896_v19 = vpop.eup %2895 }
 0x32a   : > { %v1400_v20 = vsel %vm1397_vm14, %v1399_v14, %v1395_v12  ;;  %vm1409_vm5 = vmor %vm1407_vm4, %vm1408_vm15  ;;  %v1427_v28 = vmul.f32 16.0, %v2896_v19  ;;  %vm1431_vm10 = vweird.f32 %v2896_v19  ;;  %v1641_v12 = vld [vmem:[%s3782_s15] sm:$0x1] }
 0x32b   : > { %v1404_v13 = vsub.f32 1.0, %v1403_v10  ;;  %v1401_v25 = vmul.f32 %v3297_v27, %v1400_v20  ;;  %v1200_v27 = vadd.f32 %v2892_v3, %v1199_v31 }
 0x32c   : > { %v1428_v43 = vsub.f32 1.0, %v1427_v28 }
 0x32d   : > { %v1405_v17 = vmul.f32 %v2894_v5, %v1404_v13  ;;  %v1417_v33 = vsel %vm1368_vm6, %v1401_v25, 0.0  ;;  %v3335_v52 = vsel %vm1201_vm8, %v2892_v3, %v1200_v27 }
 0x32e   : > { %v1429_v48 = vmul.f32 %v2896_v19, %v1428_v43  ;;  %v1203_v59 = vmul.f32 %v3335_v52, %v1195_v47 }
 0x32f   : > { %v1406_v22 = vadd.f32 %v2894_v5, %v1405_v17 }
 0x330   : > { %v1430_v60 = vadd.f32 %v2896_v19, %v1429_v48 }
 0x331   : > { %v1410_v26 = vsel %vm1409_vm5, %v2894_v5, %v1406_v22 }
 0x332   : > { %v1415_v29 = vsel %vm1412_vm7, %v1414_v23, %v1410_v26  ;;  %v3345_v2 = vsel %vm1431_vm10, %v2896_v19, %v1430_v60 }
 0x333   : > { %v1416_v32 = vmul.f32 %v3301_v30, %v1415_v29 }
 0x335   : > { %v1418_v34 = vsel %vm1368_vm6, %v1416_v32, 0.0 }
 0x336   : > { %v1419_v44 = vadd.f32 %v1418_v34, %v1417_v33 }
 0x338   : > { %v1420_v45 = vrot.slane %v1419_v44, 4 }
 0x339   : > { %v2855_v46 = vpop.permute.xlu1 %2854 }
 0x33a   : > { %v1421_v49 = vadd.f32 %v1420_v45, %v1419_v44  ;;  %v1261_v50 = vpop.f32.mrf.mxu0  ;;  %v2856_v51 = vunpack.i.l.bf16 %v2855_v46  ;;  %v2857_v55 = vunpack.i.h.bf16 %v2855_v46 }
 0x33b   : > { %v1264_v30 = vmul.f32 0.17677669, %v1261_v50 }
 0x33c   : > { %1227 = vmatpush.msrb.mxu3 %v2856_v51  ;;  %v1422_v56 = vrot.slane %v1421_v49, 2 }
 0x33d   : > { %v1265_v57 = vsel %vm3279_vm2, -1e+09, %v1264_v30  ;;  %vm1500_vm2 = vcmp.eq.s32.totalorder %v1499_v63, 1 }
 0x33e   : > { %1228 = vmatpush.msrb.mxu3 %v2857_v55  ;;  %v1266_v61 = vsel %vm1164_vm3, %v1265_v57, -inf  ;;  %v1423_v0 = vadd.f32 %v1422_v56, %v1421_v49 }
 0x33f   : > { %1267 = vmax.xlane.f32.xlu2 %v1266_v61  ;;  %2734 = vmatmul.msk.f32.vlgmr.msrb.gmra.mxu3 %vm1164_vm3, %v1203_v59 }
 0x340   : > { %1455 = vmatpush.msra.mxu3 %v1435_v1  ;;  %v1424_v3 = vrot.slane %v1423_v0, 1  ;;  %v2960_v1 = vmov 2  }
 0x341   : > { %v1646_v15 = vpop.permute.xlu1 %1645  ;;  %2864 = vset.pattern.permute.xlu1 %v2960_v1  ;;  %v1617_v1 = vld [vmem:[%s3780_s13 + $0x68] sm:$0xff] }
 0x342   : > { %2747 = vmatpush.xpose.msk.msrb.mxu3 %vm928_vm0, %v3223_v40  ;;  %v1489_v4 = vpop.f32.mrf.mxu0  ;;  %v1425_v5 = vadd.f32 %v1424_v3, %v1423_v0  ;;  %v1648_v31 = vperm.slane %v1646_v15, 0 }
 0x343   : > { %v1495_v6 = vmul.f32 0.17677669, %v1489_v4 }
 0x344   : > { %v1433_v7 = vmul.f32 %v3345_v2, %v1425_v5 }
 0x345   : > { %v1501_v8 = vsel %vm1500_vm2, -1e+09, %v1495_v6 }
 0x346   : > { %2748 = vmatpush.xpose.msk.msrb.mxu3 %vm928_vm0, %v3213_v36  ;;  %v1503_v9 = vsel %vm1368_vm6, %v1501_v8, -inf }
 0x347   : > { %1504 = vmax.xlane.f32.xlu1 %v1503_v9  ;;  %2742 = vmatmul.msk.f32.vlgmr.msra.gmra.mxu3 %vm1368_vm6, %v1433_v7 }
 0x34a   : > { %2751 = vmatpush.xpose.msk.msra.mxu3 %vm928_vm0, %v3215_v39  ;;  %v1492_v10 = vpop.f32.mrf.mxu0 }
 0x34b   : > { %v1496_v11 = vmul.f32 0.17677669, %v1492_v10 }
 0x34d   : > { %v1502_v13 = vsel %vm1500_vm2, -1e+09, %v1496_v11 }
 0x34e   : > { %v1506_v14 = vsel %vm1368_vm6, %v1502_v13, -inf }
 0x34f   : > { %2749 = vmatmul.msk.f32.vlgmr.msrb.gmra.mxu3 %vm928_vm0, %v1641_v12  ;;  %1507 = vmax.xlane.f32.xlu0 %v1506_v14 }
 0x350   : > { %1869 = vmatpush.msrb.mxu3 %v3225_v41 }
 0x3b2   : > { %v1268_v16 = vpop.xlane.xlu2 %1267 }
 0x3b3   : > { %v1269_v17 = vsub.f32 %v1265_v57, %v1268_v16 }
 0x3b5   : > { %v1270_v18 = vmul.f32 1.442695, %v1269_v17 }
 0x3b7   : > { %2897 = vpow2.f32 %v1270_v18 }
 0x3ba   : > { %v1505_v39 = vpop.xlane.xlu1 %1504 }
 0x3bb   : > { %v1509_v19 = vsub.f32 %v1501_v8, %v1505_v39 }
 0x3bd   : > { %v2898_v20 = vpop.eup %2897  ;;  %v1511_v21 = vmul.f32 1.442695, %v1509_v19 }
 0x3be   : > { %v1272_v22 = vsel %vm1164_vm3, %v2898_v20, 0.0 }
 0x3bf   : > { %2899 = vpow2.f32 %v1511_v21  ;;  %1273 = vadd.xlane.f32.xlu1 %v1272_v22 }
 0x3c2   : > { %v3361_v23 = vpop.f32.mrf.mxu3  ;;  %v1508_v26 = vpop.xlane.xlu0 %1507 }
 0x3c3   : > { %v1510_v29 = vsub.f32 %v1502_v13, %v1508_v26 }
 0x3c5   : > { %v3363_v24 = vpop.eup %2899  ;;  %v1513_v32 = vmul.f32 1.442695, %v1510_v29 }
 0x3c6   : > { %v1515_v25 = vsel %vm1368_vm6, %v3363_v24, 0.0 }
 0x3c7   : > { %1516 = vadd.xlane.f32.xlu0 %v1515_v25  ;;  %2901 = vpow2.f32 %v1513_v32 }
 0x3ca   : > { %v3367_v28 = vpop.f32.mrf.mxu3 }
 0x3cd   : > { %v3372_v43 = vpop.eup %2901 }
 0x3ce   : > { %v1518_v44 = vsel %vm1368_vm6, %v3372_v43, 0.0 }
 0x3d2   : > { %v1669_v33 = vpop.f32.mrf.mxu3 }
 0x3d3   : > { %v1670_v34 = vadd.f32 %v1669_v33, %v1648_v31 }
 0x3d5   : > { %v1672_v37 = vsel %vm1159_vm1, -1e+09, %v1670_v34 }
 0x3d6   : > { %v1674_v38 = vsel %vm1673_vm11, %v1672_v37, -inf }
 0x3d7   : > { %1675 = vmax.xlane.f32.xlu2 %v1674_v38 }
 0x3db   : > { %2860 = vrot.lane.b32.xlu0 %v3315_v35, %s3806_s7 }
 0x3df   : > { %1519 = vadd.xlane.f32.xlu2 %v1518_v44 }
 0x3f7   : > { %1561 = vrot.lane.b32.xlu2 %v3256_v53, %s3803_s30 }
 0x432   : > { %v1274_v27 = vpop.xlane.xlu1 %1273 }
 0x433   : > { %2903 = vrcp.f32 %v1274_v27  ;;  %v1286_v47 = vand.u32 2147483648, %v1274_v27  ;;  %v1284_v49 = vand.u32 2147483647, %v1274_v27  ;;  %vm1280_vm12 = vweird.f32 %v1274_v27 }
 0x435   : > { %v1287_v35 = vor.u32 1.1754944e-38, %v1286_v47  ;;  %vm1285_vm14 = vcmp.eq.f32.partialorder %v1284_v49, 8.507059e+37 }
 0x439   : > { %v2904_v62 = vpop.eup %2903 }
 0x43a   : > { %v1276_v45 = vmul.f32 %v2904_v62, %v1274_v27  ;;  %vm1281_vm1 = vweird.f32 %v2904_v62  ;;  %v1517_v51 = vpop.xlane.xlu0 %1516 }
 0x43b   : > { %vm1282_vm13 = vmor %vm1280_vm12, %vm1281_vm1  ;;  %2905 = vrcp.f32 %v1517_v51  ;;  %v1532_v18 = vand.u32 2147483648, %v1517_v51  ;;  %vm1526_vm4 = vweird.f32 %v1517_v51  ;;  %v1530_v39 = vand.u32 2147483647, %v1517_v51 }
 0x43c   : > { %v1277_v46 = vsub.f32 1.0, %v1276_v45 }
 0x43d   : > { %v1533_v22 = vor.u32 1.1754944e-38, %v1532_v18  ;;  %vm1531_vm7 = vcmp.eq.f32.partialorder %v1530_v39, 8.507059e+37 }
 0x43e   : > { %v1278_v48 = vmul.f32 %v2904_v62, %v1277_v46 }
 0x440   : > { %v1279_v50 = vadd.f32 %v2904_v62, %v1278_v48 }
 0x441   : > { %v2906_v57 = vpop.eup %2905 }
 0x442   : > { %v1283_v30 = vsel %vm1282_vm13, %v2904_v62, %v1279_v50  ;;  %v1522_v0 = vmul.f32 %v2906_v57, %v1517_v51  ;;  %vm1527_vm15 = vweird.f32 %v2906_v57 }
 0x443   : > { %v1288_v54 = vsel %vm1285_vm14, %v1287_v35, %v1283_v30  ;;  %vm1528_vm5 = vmor %vm1526_vm4, %vm1527_vm15  ;;  %vm1600_vm14 = vcmask 523264   ;;  %vm1602_vm15 = vcmask 785408   ;;  %vm1750_vm4 = vcmask 57344  }
 0x444   : > { %v1289_v55 = vmul.f32 %v2898_v20, %v1288_v54  ;;  %v1523_v8 = vsub.f32 1.0, %v1522_v0  ;;  %v1618_v0 = vld [vmem:[%s3780_s13 + $0x70] sm:$0xff] }
 0x446   : > { %v1290_v53 = vsel %vm1164_vm3, %v1289_v55, 0.0  ;;  %v1524_v12 = vmul.f32 %v2906_v57, %v1523_v8  ;;  %v2961_v55 = vmov 1   ;;  %v1610_v8 = vld [vmem:[%s3780_s13 + $0x30] sm:$0xff] }
 0x447   : > { %v1291_v56 = vrot.slane %v1290_v53, 4  ;;  %2865 = vset.pattern.permute.xlu2 %v2961_v55 }
 0x448   : > { %v1525_v16 = vadd.f32 %v2906_v57, %v1524_v12  ;;  %v1606_v12 = vld [vmem:[%s3780_s13 + $0x10] sm:$0xff] }
 0x449   : > { %v1292_v59 = vadd.f32 %v1291_v56, %v1290_v53 }
 0x44a   : > { %v1676_v60 = vpop.xlane.xlu2 %1675  ;;  %v1529_v21 = vsel %vm1528_vm5, %v2906_v57, %v1525_v16 }
 0x44b   : > { %v1293_v61 = vrot.slane %v1292_v59, 2  ;;  %v1677_v63 = vsub.f32 %v1672_v37, %v1676_v60  ;;  %v1534_v31 = vsel %vm1531_vm7, %v1533_v22, %v1529_v21  ;;  %v1798_v60 = vld [vmem:[%s3782_s15 + $0x2] sm:$0x1] }
 0x44c   : > { %v1535_v34 = vmul.f32 %v3363_v24, %v1534_v31 }
 0x44d   : > { %v1678_v3 = vmul.f32 1.442695, %v1677_v63  ;;  %v2861_v4 = vpop.permute.xlu0 %2860  ;;  %v1294_v5 = vadd.f32 %v1293_v61, %v1292_v59  ;;  %v1619_v63 = vld [vmem:[%s3780_s13 + $0x78] sm:$0xff] }
 0x44e   : > { %v2862_v6 = vunpack.i.l.bf16 %v2861_v4  ;;  %v2863_v9 = vunpack.i.h.bf16 %v2861_v4  ;;  %v1551_v44 = vsel %vm1368_vm6, %v1535_v34, 0.0  ;;  %1621 = vmatpush.msrb.mxu2 %v1619_v63  ;;  %v1614_v4 = vld [vmem:[%s3780_s13 + $0x50] sm:$0xff]  ;;  %v1620_v34 = vld [vmem:[%s3781_s14] sm:$0x1] }
 0x44f   : > { %2907 = vpow2.f32 %v1678_v3  ;;  %v1295_v7 = vrot.slane %v1294_v5, 1  ;;  %v1616_v3 = vld [vmem:[%s3780_s13 + $0x60] sm:$0xff] }
 0x450   : > { %1321 = vmatpush.msra.mxu1 %v2862_v6  ;;  %1622 = vmatpush.msrb.mxu2 %v1618_v0  ;;  %v1612_v6 = vld [vmem:[%s3780_s13 + $0x40] sm:$0xff] }
 0x451   : > { %v1296_v10 = vadd.f32 %v1295_v7, %v1294_v5  ;;  %v1613_v5 = vld [vmem:[%s3780_s13 + $0x48] sm:$0xff]  ;;  %v1611_v7 = vld [vmem:[%s3780_s13 + $0x38] sm:$0xff] }
 0x452   : > { %v1520_v11 = vpop.xlane.xlu2 %1519  ;;  %1322 = vmatpush.msra.mxu1 %v2863_v9  ;;  %1623 = vmatpush.msrb.mxu2 %v1617_v1  ;;  %v1609_v9 = vld [vmem:[%s3780_s13 + $0x28] sm:$0xff] }
 0x453   : > { %2909 = vrcp.f32 %v1520_v11  ;;  %v1297_v13 = vmul.f32 %v1296_v10, %v3335_v52  ;;  %v1547_v25 = vand.u32 2147483648, %v1520_v11  ;;  %v1545_v29 = vand.u32 2147483647, %v1520_v11  ;;  %v1608_v10 = vld [vmem:[%s3780_s13 + $0x20] sm:$0xff] }
 0x454   : > { %vm1541_vm9 = vweird.f32 %v1520_v11  ;;  %1624 = vmatpush.msrb.mxu2 %v1616_v3 }
 0x455   : > { %v3382_v14 = vpop.eup %2907  ;;  %2738 = vmatmul.msk.f32.vlgmr.msra.gmra.mxu1 %vm1164_vm3, %v1297_v13  ;;  %v1548_v33 = vor.u32 1.1754944e-38, %v1547_v25  ;;  %vm1546_vm2 = vcmp.eq.f32.partialorder %v1545_v29, 8.507059e+37  ;;  %v1605_v13 = vld [vmem:[%s3780_s13 + $0x8] sm:$0xff] }
 0x456   : > { %v1680_v15 = vsel %vm1673_vm11, %v3382_v14, 0.0 }
 0x457   : > { %1681 = vadd.xlane.f32.xlu1 %v1680_v15 }
 0x459   : > { %v2910_v17 = vpop.eup %2909 }
 0x45a   : > { %v1537_v19 = vmul.f32 %v2910_v17, %v1520_v11  ;;  %v1562_v20 = vpop.permute.xlu2 %1561  ;;  %vm1542_vm8 = vweird.f32 %v2910_v17  ;;  %v1607_v11 = vld [vmem:[%s3780_s13 + $0x18] sm:$0xff] }
 0x45b   : > { %1582 = vmatpush.msrb.mxu1 %v1562_v20  ;;  %vm1543_vm10 = vmor %vm1541_vm9, %vm1542_vm8 }
 0x45c   : > { %v1538_v52 = vsub.f32 1.0, %v1537_v19 }
 0x45d   : > { %1715 = vmatpush.msra.mxu1 %v3223_v40 }
 0x45e   : > { %v1539_v26 = vmul.f32 %v2910_v17, %v1538_v52 }
 0x45f   : > { %1716 = vmatpush.msra.mxu1 %v3213_v36 }
 0x460   : > { %v1540_v32 = vadd.f32 %v2910_v17, %v1539_v26 }
 0x462   : > { %v1544_v37 = vsel %vm1543_vm10, %v2910_v17, %v1540_v32 }
 0x463   : > { %v1549_v38 = vsel %vm1546_vm2, %v1548_v33, %v1544_v37 }
 0x464   : > { %v1550_v40 = vmul.f32 %v3372_v43, %v1549_v38  ;;  %v1721_v43 = vld [vmem:[%s3782_s15 + $0x1] sm:$0x1] }
 0x465   : > { %2752 = vmatmul.msk.f32.vlgmr.msra.gmra.mxu3 %vm928_vm0, %v1721_v43  ;;  %v2761_v43 = vld [vmem:[%s3784_s17 + $0x30] sm:$0xff] }
 0x466   : > { %v1552_v27 = vsel %vm1368_vm6, %v1550_v40, 0.0 }
 0x467   : > { %v1553_v62 = vadd.f32 %v1552_v27, %v1551_v44 }
 0x469   : > { %v1554_v45 = vrot.slane %v1553_v62, 4 }
 0x46b   : > { %v1555_v46 = vadd.f32 %v1554_v45, %v1553_v62 }
 0x46d   : > { %v1556_v36 = vrot.slane %v1555_v46, 2 }
 0x46f   : > { %v1557_v47 = vadd.f32 %v1556_v36, %v1555_v46 }
 0x470   : > { %1800 = vperm.xlu1 %2864, %v3323_v42  }
 0x471   : > { %v1558_v48 = vrot.slane %v1557_v47, 1 }
 0x473   : > { %v1559_v49 = vadd.f32 %v1558_v48, %v1557_v47 }
 0x475   : > { %v1560_v24 = vmul.f32 %v1559_v49, %v3345_v2 }
 0x477   : > { %2746 = vmatmul.msk.f32.vlgmr.msrb.gmra.mxu1 %vm1368_vm6, %v1560_v24  ;;  %v2762_v24 = vld [vmem:[%s3784_s17 + $0x38] sm:$0xff] }
 0x478   : > { %2754 = vmatpush.xpose.msk.msrb.mxu1 %vm928_vm0, %v3225_v41  ;;  %1592 = vrot.lane.b32.xlu1 %v3367_v28, %s3803_s30  ;;  %s3840_s30 = smov 32  }
 0x479   : > { %2866 = vset.pattern.permute.xlu1 %v2956_v58  ;;  %1973 = vmatpush.msra.mxu3 %v2762_v24  ;;  %v2795_v24 = vld [vmem:[%s3788_s21 + $0x38] sm:$0xff] }
 0x47b   : > { %1974 = vmatpush.msra.mxu3 %v2761_v43  ;;  %v2794_v43 = vld [vmem:[%s3788_s21 + $0x30] sm:$0xff] }
 0x4ca   : > { %v1682_v50 = vpop.xlane.xlu1 %1681 }
 0x4cb   : > { %2911 = vrcp.f32 %v1682_v50  ;;  %v1694_v41 = vand.u32 2147483648, %v1682_v50  ;;  %v1692_v28 = vand.u32 2147483647, %v1682_v50  ;;  %vm1688_vm1 = vweird.f32 %v1682_v50 }
 0x4cd   : > { %v1695_v53 = vor.u32 1.1754944e-38, %v1694_v41  ;;  %vm1693_vm13 = vcmp.eq.f32.partialorder %v1692_v28, 8.507059e+37 }
 0x4d1   : > { %v2912_v51 = vpop.eup %2911 }
 0x4d2   : > { %v1684_v2 = vmul.f32 %v2912_v51, %v1682_v50  ;;  %v1324_v35 = vpop.f32.mrf.mxu1  ;;  %vm1689_vm11 = vweird.f32 %v2912_v51  ;;  %v2760_v50 = vld [vmem:[%s3784_s17 + $0x28] sm:$0xff] }
 0x4d3   : > { %1588 = vrot.lane.b32.xlu2 %v1324_v35, %s3806_s7  ;;  %vm1690_vm12 = vmor %vm1688_vm1, %vm1689_vm11  ;;  %1975 = vmatpush.msra.mxu3 %v2760_v50  ;;  %v1876_v35 = vld [vmem:[%s3784_s17 + $0x10] sm:$0xff]  ;;  %v2793_v50 = vld [vmem:[%s3788_s21 + $0x28] sm:$0xff]  ;;  %s2966_s7 = smov 4  }
 0x4d4   : > { %v1685_v30 = vsub.f32 1.0, %v1684_v2  ;;  %v1877_v2 = vld [vmem:[%s3784_s17 + $0x18] sm:$0xff] }
 0x4d5   : > { %1896 = vmatpush.msrb.mxu0 %v1877_v2  ;;  %v2776_v2 = vld [vmem:[%s3786_s19 + $0x28] sm:$0xff] }
 0x4d6   : > { %v1686_v54 = vmul.f32 %v2912_v51, %v1685_v30  ;;  %v1875_v30 = vld [vmem:[%s3784_s17 + $0x8] sm:$0xff] }
 0x4d7   : > { %1897 = vmatpush.msrb.mxu0 %v1876_v35  ;;  %v2775_v35 = vld [vmem:[%s3786_s19 + $0x20] sm:$0xff] }
 0x4d8   : > { %v1687_v58 = vadd.f32 %v2912_v51, %v1686_v54  ;;  %v1874_v54 = vld [vmem:[%s3784_s17] sm:$0xff] }
 0x4d9   : > { %1898 = vmatpush.msrb.mxu0 %v1875_v30  ;;  %v2174_v30 = vld [vmem:[%s3790_s23 + $0x8] sm:$0xff] }
 0x4da   : > { %v1691_v56 = vsel %vm1690_vm12, %v2912_v51, %v1687_v58  ;;  %v2759_v51 = vld [vmem:[%s3784_s17 + $0x20] sm:$0xff] }
 0x4db   : > { %v1696_v57 = vsel %vm1693_vm13, %v1695_v53, %v1691_v56  ;;  %1976 = vmatpush.msra.mxu3 %v2759_v51  ;;  %1899 = vmatpush.msrb.mxu0 %v1874_v54  ;;  %v2792_v51 = vld [vmem:[%s3788_s21 + $0x20] sm:$0xff] }
 0x4dc   : > { %v1697_v59 = vmul.f32 %v3382_v14, %v1696_v57  ;;  %v1604_v14 = vld [vmem:[%s3780_s13] sm:$0xff] }
 0x4dd   : > { %v2783_v54 = vld [vmem:[%s3785_s18 + $0x3] sm:$0x1] }
 0x4de   : > { %2750 = vmatmul.msk.f32.vlgmr.msra.gmra.mxu1 %vm1164_vm3, %v1697_v59 }
 0x4e2   : > { %v1801_v15 = vpop.permute.xlu1 %1800 }
 0x4e6   : > { %2755 = vmatmul.msk.f32.vlgmr.msrb.gmra.mxu1 %vm928_vm0, %v1798_v60 }
 0x4e8   : > { %v1747_v52 = vpop.f32.mrf.mxu3 }
 0x4ea   : > { %v1593_v18 = vpop.permute.xlu1 %1592 }
 0x4f4   : > { %v1584_v61 = vpop.f32.mrf.mxu1 }
 0x4f5   : > { %1596 = vrot.lane.b32.xlu2 %v1584_v61, %s3805_s1 }
 0x4fd   : > { %1723 = vperm.xlu2 %2865, %v3323_v42   ;;  %v1615_v42 = vld [vmem:[%s3780_s13 + $0x58] sm:$0xff] }
 0x4fe   : > { %1625 = vmatpush.msrb.mxu2 %v1615_v42 }
 0x500   : > { %1626 = vmatpush.msrb.mxu2 %v1614_v4 }
 0x502   : > { %1627 = vmatpush.msrb.mxu2 %v1613_v5 }
 0x504   : > { %1628 = vmatpush.msrb.mxu2 %v1612_v6 }
 0x506   : > { %1629 = vmatpush.msrb.mxu2 %v1611_v7  ;;  %v2782_v7 = vld [vmem:[%s3784_s17 + $0x78] sm:$0xff] }
 0x508   : > { %1630 = vmatpush.msrb.mxu2 %v1610_v8 }
 0x50a   : > { %1631 = vmatpush.msrb.mxu2 %v1609_v9  ;;  %v2781_v9 = vld [vmem:[%s3784_s17 + $0x70] sm:$0xff] }
 0x50c   : > { %1632 = vmatpush.msrb.mxu2 %v1608_v10 }
 0x50e   : > { %1633 = vmatpush.msrb.mxu2 %v1607_v11 }
 0x510   : > { %1634 = vmatpush.msrb.mxu2 %v1606_v12  ;;  %v2780_v12 = vld [vmem:[%s3784_s17 + $0x68] sm:$0xff] }
 0x512   : > { %1635 = vmatpush.msrb.mxu2 %v1605_v13 }
 0x514   : > { %1636 = vmatpush.msrb.mxu2 %v1604_v14 }
 0x516   : > { %2082 = vmatpush.msra.mxu2 %v2776_v2 }
 0x518   : > { %2083 = vmatpush.msra.mxu2 %v2775_v35 }
 0x52d   : > { %v1589_v16 = vpop.permute.xlu2 %1588 }
 0x52e   : > { %v1599_v17 = vsel %vm928_vm0, %v3361_v23, %v1589_v16  ;;  %v1803_v23 = vperm.slane %v1801_v15, 0 }
 0x52f   : > { %v1601_v39 = vsel %vm1600_vm14, %v1599_v17, %v1593_v18  ;;  %v2779_v18 = vld [vmem:[%s3784_s17 + $0x60] sm:$0xff] }
 0x54f   : > { %v1597_v19 = vpop.permute.xlu2 %1596 }
 0x550   : > { %v1603_v20 = vsel %vm1602_vm15, %v1601_v39, %v1597_v19  ;;  %v2766_v39 = vld [vmem:[%s3786_s19 + $0x18] sm:$0xff]  ;;  %v1906_v19 = vld [vmem:[%s3786_s19 + $0x8] sm:$0xff] }
 0x551   : > { %1637 = vmatmul.f32.vlgmr.msrb.gmra.mxu2 %v1603_v20  ;;  %v2765_v20 = vld [vmem:[%s3786_s19 + $0x10] sm:$0xff]  ;;  %1925 = vmatpush.msra.mxu1 %v1906_v19 }
 0x552   : > { %2193 = vmatpush.msrb.mxu2 %v2174_v30 }
 0x557   : > { %v1724_v21 = vpop.permute.xlu2 %1723 }
 0x558   : > { %v1726_v22 = vperm.slane %v1724_v21, 0  ;;  %v1905_v21 = vld [vmem:[%s3786_s19] sm:$0xff] }
 0x559   : > { %1926 = vmatpush.msra.mxu1 %v1905_v21 }
 0x55a   : > { %v1748_v25 = vadd.f32 %v1747_v52, %v1726_v22  ;;  %v2772_v52 = vld [vmem:[%s3784_s17 + $0x58] sm:$0xff]  ;;  %v2771_v22 = vld [vmem:[%s3784_s17 + $0x50] sm:$0xff] }
 0x55b   : > { %v3466_v26 = vpop.f32.mrf.mxu1  ;;  %2051 = vmatpush.msrb.mxu1 %v2772_v52 }
 0x55c   : > { %v1751_v29 = vsel %vm1750_vm4, %v1748_v25, -inf }
 0x55d   : > { %1752 = vmax.xlane.f32.xlu2 %v1751_v29  ;;  %2052 = vmatpush.msrb.mxu1 %v2771_v22  ;;  %v2769_v29 = vld [vmem:[%s3784_s17 + $0x40] sm:$0xff] }
 0x55e   : > { %v2175_v22 = vld [vmem:[%s3791_s24] sm:$0x1] }
 0x563   : > { %v1824_v31 = vpop.f32.mrf.mxu1 }
 0x564   : > { %v1825_v32 = vadd.f32 %v1824_v31, %v1803_v23 }
 0x566   : > { %v1827_v33 = vsel %vm1750_vm4, %v1825_v32, -inf }
 0x567   : > { %1828 = vmax.xlane.f32.xlu0 %v1827_v33 }
 0x5d0   : > { %v1753_v40 = vpop.xlane.xlu2 %1752 }
 0x5d1   : > { %v1754_v62 = vsub.f32 %v1748_v25, %v1753_v40  ;;  %v2770_v25 = vld [vmem:[%s3784_s17 + $0x48] sm:$0xff] }
 0x5d2   : > { %2053 = vmatpush.msrb.mxu1 %v2770_v25 }
 0x5d3   : > { %v1755_v46 = vmul.f32 1.442695, %v1754_v62 }
 0x5d4   : > { %v1638_v37 = vpop.f32.mrf.mxu2  ;;  %2054 = vmatpush.msrb.mxu1 %v2769_v29 }
 0x5d5   : > { %v3473_v38 = vadd.f32 %v1638_v37, %v1620_v34  ;;  %v1878_v34 = vld [vmem:[%s3785_s18] sm:$0x1] }
 0x5d7   : > { %1957 = vrot.lane.b32.xlu0 %v3473_v38, %s3840_s30 }
 0x5da   : > { %v1829_v44 = vpop.xlane.xlu0 %1828 }
 0x5db   : > { %v1830_v27 = vsub.f32 %v1825_v32, %v1829_v44  ;;  %v2763_v32 = vld [vmem:[%s3785_s18 + $0x1] sm:$0x1] }
 0x5dd   : > { %v1831_v45 = vmul.f32 1.442695, %v1830_v27 }
 0x5df   : > { %2913 = vpow2.f32 %v1831_v45  ;;  %1880 = vrot.lane.b32.xlu0 %v3473_v38, %s3841_s3  ;;  %v2150_v45 = vld [vmem:[%s3788_s21 + $0x18] sm:$0xff] }
 0x5e0   : > { %2915 = vpow2.f32 %v1755_v46  ;;  %v2149_v46 = vld [vmem:[%s3788_s21 + $0x10] sm:$0xff] }
 0x5e5   : > { %v2914_v36 = vpop.eup %2913 }
 0x5e6   : > { %v1833_v47 = vsel %vm1750_vm4, %v2914_v36, 0.0  ;;  %v2916_v48 = vpop.eup %2915 }
 0x5e7   : > { %1834 = vadd.xlane.f32.xlu1 %v1833_v47  ;;  %v1757_v49 = vsel %vm1750_vm4, %v2916_v48, 0.0  ;;  %v2147_v47 = vld [vmem:[%s3788_s21] sm:$0xff] }
 0x5ef   : > { %1758 = vadd.xlane.f32.xlu1 %v1757_v49  ;;  %v2785_v49 = vld [vmem:[%s3786_s19 + $0x30] sm:$0xff] }
 0x649   : > { %v3515_v14 = vpop.permute.xlu0 %1957 }
 0x651   : > { %v1881_v17 = vpop.permute.xlu0 %1880 }
 0x65a   : > { %v1835_v41 = vpop.xlane.xlu1 %1834 }
 0x65b   : > { %2917 = vrcp.f32 %v1835_v41  ;;  %v1847_v56 = vand.u32 2147483648, %v1835_v41  ;;  %v1845_v59 = vand.u32 2147483647, %v1835_v41  ;;  %vm1841_vm7 = vweird.f32 %v1835_v41 }
 0x65d   : > { %v1848_v63 = vor.u32 1.1754944e-38, %v1847_v56  ;;  %vm1846_vm9 = vcmp.eq.f32.partialorder %v1845_v59, 8.507059e+37  ;;  %v2773_v56 = vld [vmem:[%s3785_s18 + $0x2] sm:$0x1] }
 0x661   : > { %v2918_v28 = vpop.eup %2917 }
 0x662   : > { %v1837_v55 = vmul.f32 %v2918_v28, %v1835_v41  ;;  %v1759_v58 = vpop.xlane.xlu1 %1758  ;;  %vm1842_vm5 = vweird.f32 %v2918_v28  ;;  %v2173_v41 = vld [vmem:[%s3790_s23] sm:$0xff] }
 0x663   : > { %2919 = vrcp.f32 %v1759_v58  ;;  %vm1843_vm8 = vmor %vm1841_vm7, %vm1842_vm5  ;;  %vm1765_vm10 = vweird.f32 %v1759_v58  ;;  %v1771_v42 = vand.u32 2147483648, %v1759_v58  ;;  %v1769_v5 = vand.u32 2147483647, %v1759_v58  ;;  %2194 = vmatpush.msrb.mxu2 %v2173_v41 }
 0x664   : > { %v1838_v53 = vsub.f32 1.0, %v1837_v55 }
 0x665   : > { %v1772_v10 = vor.u32 1.1754944e-38, %v1771_v42  ;;  %vm1770_vm1 = vcmp.eq.f32.partialorder %v1769_v5, 8.507059e+37  ;;  %v2798_v42 = vld [vmem:[%s3790_s23 + $0x10] sm:$0xff] }
 0x666   : > { %v1839_v57 = vmul.f32 %v2918_v28, %v1838_v53  ;;  %v2206_v5 = vld [vmem:[%s3792_s25 + $0x30] sm:$0xff] }
 0x668   : > { %v1840_v60 = vadd.f32 %v2918_v28, %v1839_v57 }
 0x669   : > { %v2920_v61 = vpop.eup %2919 }
 0x66a   : > { %v1844_v0 = vsel %vm1843_vm8, %v2918_v28, %v1840_v60  ;;  %v1761_v1 = vmul.f32 %v2920_v61, %v1759_v58  ;;  %vm1766_vm2 = vweird.f32 %v2920_v61 }
 0x66b   : > { %v1849_v3 = vsel %vm1846_vm9, %v1848_v63, %v1844_v0  ;;  %vm1767_vm11 = vmor %vm1765_vm10, %vm1766_vm2 }
 0x66c   : > { %v1762_v4 = vsub.f32 1.0, %v1761_v1  ;;  %v1850_v6 = vmul.f32 %v2914_v36, %v1849_v3  ;;  %v2148_v36 = vld [vmem:[%s3788_s21 + $0x8] sm:$0xff]  ;;  %v2799_v3 = vld [vmem:[%s3790_s23 + $0x18] sm:$0xff] }
 0x66e   : > { %v1763_v8 = vmul.f32 %v2920_v61, %v1762_v4  ;;  %2756 = vmatmul.msk.f32.vlgmr.msrb.gmra.mxu3 %vm1368_vm6, %v1850_v6  ;;  %v2207_v4 = vld [vmem:[%s3792_s25 + $0x38] sm:$0xff]  ;;  %v2205_v6 = vld [vmem:[%s3792_s25 + $0x28] sm:$0xff] }
 0x66f   : > { %2110 = vmatpush.msrb.mxu3 %v2782_v7 }
 0x670   : > { %v1764_v11 = vadd.f32 %v2920_v61, %v1763_v8  ;;  %v2204_v8 = vld [vmem:[%s3792_s25 + $0x20] sm:$0xff] }
 0x671   : > { %2111 = vmatpush.msrb.mxu3 %v2781_v9  ;;  %v2203_v9 = vld [vmem:[%s3792_s25 + $0x18] sm:$0xff] }
 0x672   : > { %v1768_v13 = vsel %vm1767_vm11, %v2920_v61, %v1764_v11  ;;  %v2151_v61 = vld [vmem:[%s3789_s22] sm:$0x1] }
 0x673   : > { %v1773_v15 = vsel %vm1770_vm1, %v1772_v10, %v1768_v13  ;;  %2112 = vmatpush.msrb.mxu3 %v2780_v12  ;;  %v2202_v10 = vld [vmem:[%s3792_s25 + $0x10] sm:$0xff]  ;;  %v2201_v12 = vld [vmem:[%s3792_s25 + $0x8] sm:$0xff]  ;;  %v2200_v13 = vld [vmem:[%s3792_s25] sm:$0xff] }
 0x674   : > { %v1774_v16 = vmul.f32 %v2916_v48, %v1773_v15  ;;  %v2786_v48 = vld [vmem:[%s3786_s19 + $0x38] sm:$0xff]  ;;  %v2808_v15 = vld [vmem:[%s3792_s25 + $0x70] sm:$0xff] }
 0x675   : > { %2113 = vmatpush.msrb.mxu3 %v2779_v18  ;;  %v2806_v18 = vld [vmem:[%s3792_s25 + $0x60] sm:$0xff] }
 0x676   : > { %2753 = vmatmul.msk.f32.vlgmr.msra.gmra.mxu0 %vm1368_vm6, %v1774_v16  ;;  %2764 = vmatmul.msk.f32.vlgmr.msra.gmra.mxu3 %vm928_vm0, %v3515_v14  ;;  %v2807_v16 = vld [vmem:[%s3792_s25 + $0x68] sm:$0xff] }
 0x677   : > { %2004 = vmatpush.msra.mxu0 %v2766_v39  ;;  %2220 = vmatpush.msra.mxu3 %v2207_v4 }
 0x679   : > { %2005 = vmatpush.msra.mxu0 %v2765_v20  ;;  %2221 = vmatpush.msra.mxu3 %v2206_v5  ;;  %v2805_v20 = vld [vmem:[%s3792_s25 + $0x58] sm:$0xff] }
 0x67b   : > { %2222 = vmatpush.msra.mxu3 %v2205_v6 }
 0x67d   : > { %2223 = vmatpush.msra.mxu3 %v2204_v8  ;;  %v2962_v8 = vmov 3  }
 0x67e   : > { %2757 = vmatmul.msk.f32.vlgmr.msrb.gmra.mxu0 %vm928_vm0, %v1881_v17 }
 0x67f   : > { %2141 = vmatpush.msrb.mxu0 %v2786_v48  ;;  %2224 = vmatpush.msra.mxu3 %v2203_v9  ;;  %v2945_v9 = vld [vmem:[%s3783_s16] sm:$0x1] }
 0x681   : > { %2142 = vmatpush.msrb.mxu0 %v2785_v49  ;;  %2225 = vmatpush.msra.mxu3 %v2202_v10 }
 0x683   : > { %2226 = vmatpush.msra.mxu3 %v2201_v12 }
 0x685   : > { %2227 = vmatpush.msra.mxu3 %v2200_v13 }
 0x6f1   : > { %v1871_v23 = vpop.f32.mrf.mxu3 }
 0x6f2   : > { %2784 = vmatmul.msk.f32.vlgmr.msrb.gmra.mxu3 %vm928_vm0, %v1871_v23 }
 0x6f3   : > { %v1795_v31 = vpop.f32.mrf.mxu0 }
 0x6f9   : > { %v1978_v33 = vpop.f32.mrf.mxu3 }
 0x6fa   : > { %v1979_v37 = vadd.f32 %v2763_v32, %v1978_v33  ;;  %v2803_v32 = vld [vmem:[%s3792_s25 + $0x48] sm:$0xff]  ;;  %v2802_v33 = vld [vmem:[%s3792_s25 + $0x40] sm:$0xff] }
 0x6fb   : > { %v1901_v40 = vpop.f32.mrf.mxu0 }
 0x6fc   : > { %v1981_v44 = vmax.f32 %v1979_v37, 0.0  ;;  %v1902_v27 = vadd.f32 %v1901_v40, %v1878_v34  ;;  %v2800_v34 = vld [vmem:[%s3791_s24 + $0x1] sm:$0x1] }
 0x6fe   : > { %v1904_v62 = vmax.f32 %v1902_v27, 0.0  ;;  %2768 = vmatmul.msk.f32.vlgmr.msra.gmra.mxu0 %vm1164_vm3, %v1981_v44  ;;  %v1907_v27 = vld [vmem:[%s3787_s20] sm:$0x1] }
 0x6ff   : > { %2270 = vmatpush.msra.mxu0 %v2795_v24 }
 0x700   : > { %2758 = vmatmul.msk.f32.vlgmr.msra.gmra.mxu1 %vm1164_vm3, %v1904_v62 }
 0x701   : > { %2164 = vmatpush.msra.mxu1 %v2150_v45  ;;  %2271 = vmatpush.msra.mxu0 %v2794_v43  ;;  %v2208_v45 = vld [vmem:[%s3793_s26] sm:$0x1] }
 0x703   : > { %2165 = vmatpush.msra.mxu1 %v2149_v46  ;;  %2272 = vmatpush.msra.mxu0 %v2793_v50  ;;  %v2767_v46 = vld [vmem:[%s3787_s20 + $0x1] sm:$0x1] }
 0x705   : > { %2166 = vmatpush.msra.mxu1 %v2148_v36  ;;  %2273 = vmatpush.msra.mxu0 %v2792_v51 }
 0x707   : > { %2167 = vmatpush.msra.mxu1 %v2147_v47 }
 0x708   : > { %2774 = vmatmul.msk.f32.vlgmr.msrb.gmra.mxu1 %vm928_vm0, %v1795_v31  ;;  %v2804_v31 = vld [vmem:[%s3792_s25 + $0x50] sm:$0xff] }
 0x709   : > { %2301 = vmatpush.msrb.mxu1 %v2799_v3 }
 0x70b   : > { %2302 = vmatpush.msrb.mxu1 %v2798_v42 }
 0x710   : > { %2789 = vmatmul.msk.f32.vlgmr.msra.gmra.mxu1 %vm928_vm0, %v1881_v17  ;;  %v2796_v17 = vld [vmem:[%s3789_s22 + $0x1] sm:$0x1] }
 0x775   : > { %v2115_v28 = vpop.f32.mrf.mxu3 }
 0x776   : > { %v2116_v55 = vadd.f32 %v2783_v54, %v2115_v28 }
 0x778   : > { %v2118_v58 = vmax.f32 %v2116_v55, 0.0 }
 0x77a   : > { %2788 = vmatmul.msk.f32.vlgmr.msrb.gmra.mxu0 %vm1164_vm3, %v2118_v58 }
 0x77b   : > { %v2007_v7 = vpop.f32.mrf.mxu0 }
 0x77c   : > { %v2008_v49 = vadd.f32 %v2767_v46, %v2007_v7 }
 0x77d   : > { %v3605_v53 = vpop.f32.mrf.mxu1 }
 0x77e   : > { %v1929_v62 = vadd.f32 %v3605_v53, %v1907_v27  ;;  %v2010_v51 = vsub.f32 0.0, %v2008_v49 }
 0x780   : > { %v1931_v36 = vsub.f32 0.0, %v1929_v62  ;;  %v2011_v2 = vmul.f32 1.442695, %v2010_v51 }
 0x782   : > { %2797 = vmatmul.msk.f32.vlgmr.msra.gmra.mxu0 %vm928_vm0, %v3515_v14  ;;  %v2809_v14 = vld [vmem:[%s3792_s25 + $0x78] sm:$0xff]  ;;  %v1932_v43 = vmul.f32 1.442695, %v1931_v36 }
 0x785   : > { %v2056_v57 = vpop.f32.mrf.mxu1 }
 0x786   : > { %v2057_v59 = vadd.f32 %v2773_v56, %v2056_v57 }
 0x788   : > { %v2059_v60 = vmax.f32 %v2057_v59, 0.0 }
 0x78a   : > { %2778 = vmatmul.msk.f32.vlgmr.msra.gmra.mxu2 %vm1164_vm3, %v2059_v60 }
 0x78b   : > { %2330 = vmatpush.msra.mxu2 %v2809_v14 }
 0x78d   : > { %v2169_v63 = vpop.f32.mrf.mxu1  ;;  %2331 = vmatpush.msra.mxu2 %v2808_v15 }
 0x78e   : > { %v2170_v0 = vadd.f32 %v2169_v63, %v2151_v61 }
 0x78f   : > { %2332 = vmatpush.msra.mxu2 %v2807_v16 }
 0x790   : > { %v2172_v1 = vmax.f32 %v2170_v0, 0.0 }
 0x791   : > { %2333 = vmatpush.msra.mxu2 %v2806_v18 }
 0x792   : > { %2790 = vmatmul.msk.f32.vlgmr.msrb.gmra.mxu2 %vm1164_vm3, %v2172_v1 }
 0x793   : > { %2334 = vmatpush.msra.mxu2 %v2805_v20 }
 0x795   : > { %2335 = vmatpush.msra.mxu2 %v2804_v31 }
 0x797   : > { %2336 = vmatpush.msra.mxu2 %v2803_v32 }
 0x799   : > { %2337 = vmatpush.msra.mxu2 %v2802_v33 }
 0x7f7   : > { %v3641_v11 = vpop.f32.mrf.mxu0 }
 0x7ff   : > { %v2275_v39 = vpop.f32.mrf.mxu0 }
 0x800   : > { %v2276_v19 = vadd.f32 %v2796_v17, %v2275_v39 }
 0x802   : > { %v2278_v21 = vmax.f32 %v2276_v19, 0.0 }
 0x804   : > { %2801 = vmatmul.msk.f32.vlgmr.msrb.gmra.mxu1 %vm1164_vm3, %v2278_v21 }
 0x80d   : > { %v3668_v52 = vpop.f32.mrf.mxu2 }
 0x815   : > { %v2196_v25 = vpop.f32.mrf.mxu2 }
 0x816   : > { %v2197_v29 = vadd.f32 %v2196_v25, %v2175_v22 }
 0x818   : > { %v2199_v23 = vmax.f32 %v2197_v29, 0.0  ;;  %v2810_v29 = vld [vmem:[%s3793_s26 + $0x1] sm:$0x1] }
 0x81a   : > { %2791 = vmatmul.msk.f32.vlgmr.msra.gmra.mxu3 %vm1600_vm14, %v2199_v23 }
 0x881   : > { %v2304_v37 = vpop.f32.mrf.mxu1 }
 0x882   : > { %v2305_v40 = vadd.f32 %v2800_v34, %v2304_v37 }
 0x884   : > { %v2307_v44 = vmax.f32 %v2305_v40, 0.0 }
 0x886   : > { %2811 = vmatmul.msk.f32.vlgmr.msra.gmra.mxu2 %vm1600_vm14, %v2307_v44 }
 0x89d   : > { %v2229_v47 = vpop.f32.mrf.mxu3 }
 0x89e   : > { %v2230_v48 = vadd.f32 %v2229_v47, %v2208_v45 }
 0x8a0   : > { %v2232_v24 = vsub.f32 0.0, %v2230_v48 }
 0x8a2   : > { %v2233_v50 = vmul.f32 1.442695, %v2232_v24  ;;  %v2777_v24 = vld [vmem:[%s3787_s20 + $0x2] sm:$0x1] }
 0x8a4   : > { %2921 = vpow2.f32 %v2233_v50  ;;  %v2787_v50 = vld [vmem:[%s3787_s20 + $0x3] sm:$0x1] }
 0x8a5   : > { %2923 = vpow2.f32 %v1932_v43  ;;  %v2086_v43 = vadd.f32 %v2777_v24, %v3668_v52  ;;  %v2145_v51 = vadd.f32 %v2787_v50, %v3641_v11 }
 0x8a6   : > { %2925 = vpow2.f32 %v2011_v2 }
 0x8aa   : > { %v2922_v35 = vpop.eup %2921 }
 0x8ab   : > { %v2924_v30 = vpop.eup %2923  ;;  %v2235_v41 = vadd.f32 1.0, %v2922_v35 }
 0x8ac   : > { %v1934_v54 = vadd.f32 1.0, %v2924_v30  ;;  %v2926_v28 = vpop.eup %2925 }
 0x8ad   : > { %2927 = vrcp.f32 %v2235_v41  ;;  %v2013_v53 = vadd.f32 1.0, %v2926_v28  ;;  %v2247_v57 = vand.u32 2147483648, %v2235_v41  ;;  %v2245_v61 = vand.u32 2147483647, %v2235_v41 }
 0x8ae   : > { %2929 = vrcp.f32 %v1934_v54  ;;  %vm2241_vm13 = vweird.f32 %v2235_v41  ;;  %v1946_v13 = vand.u32 2147483648, %v1934_v54  ;;  %vm1940_vm8 = vweird.f32 %v1934_v54 }
 0x8af   : > { %2931 = vrcp.f32 %v2013_v53  ;;  %v2248_v0 = vor.u32 1.1754944e-38, %v2247_v57  ;;  %vm2246_vm5 = vcmp.eq.f32.partialorder %v2245_v61, 8.507059e+37  ;;  %v1944_v14 = vand.u32 2147483647, %v1934_v54 }
 0x8b0   : > { %v1947_v17 = vor.u32 1.1754944e-38, %v1946_v13  ;;  %v2025_v19 = vand.u32 2147483648, %v2013_v53  ;;  %vm2019_vm11 = vweird.f32 %v2013_v53  ;;  %v2023_v20 = vand.u32 2147483647, %v2013_v53 }
 0x8b1   : > { %vm1945_vm10 = vcmp.eq.f32.partialorder %v1944_v14, 8.507059e+37 }
 0x8b2   : > { %v2026_v22 = vor.u32 1.1754944e-38, %v2025_v19  ;;  %v2816_v19 = vld [vmem:[%s3784_s17 + $0x80] sm:$0xff] }
 0x8b3   : > { %v2928_v55 = vpop.eup %2927 }
 0x8b4   : > { %v2237_v58 = vmul.f32 %v2928_v55, %v2235_v41  ;;  %v2930_v59 = vpop.eup %2929  ;;  %vm2242_vm12 = vweird.f32 %v2928_v55 }
 0x8b5   : > { %vm2243_vm4 = vmor %vm2241_vm13, %vm2242_vm12  ;;  %v1936_v1 = vmul.f32 %v2930_v59, %v1934_v54  ;;  %v2932_v5 = vpop.eup %2931  ;;  %vm1941_vm7 = vweird.f32 %v2930_v59  ;;  %vm2024_vm12 = vcmp.eq.f32.partialorder %v2023_v20, 8.507059e+37 }
 0x8b6   : > { %v2238_v56 = vsub.f32 1.0, %v2237_v58  ;;  %v2015_v7 = vmul.f32 %v2932_v5, %v2013_v53  ;;  %vm1942_vm9 = vmor %vm1940_vm8, %vm1941_vm7  ;;  %vm2020_vm2 = vweird.f32 %v2932_v5  ;;  %vm2381_vm8 = vcmask 1040384   ;;  %v2385_v58 = vld [vmem:[%s3782_s15 + $0x3] sm:$0x1] }
 0x8b7   : > { %v1937_v4 = vsub.f32 1.0, %v1936_v1  ;;  %vm2021_vm1 = vmor %vm2019_vm11, %vm2020_vm2  ;;  %vm2417_vm2 = vcmask 16384  }
 0x8b8   : > { %v2239_v60 = vmul.f32 %v2928_v55, %v2238_v56  ;;  %v2016_v12 = vsub.f32 1.0, %v2015_v7 }
 0x8b9   : > { %v1938_v6 = vmul.f32 %v2930_v59, %v1937_v4 }
 0x8ba   : > { %v2240_v63 = vadd.f32 %v2928_v55, %v2239_v60  ;;  %v2017_v16 = vmul.f32 %v2932_v5, %v2016_v12 }
 0x8bb   : > { %v1939_v10 = vadd.f32 %v2930_v59, %v1938_v6 }
 0x8bc   : > { %v2244_v3 = vsel %vm2243_vm4, %v2928_v55, %v2240_v63  ;;  %v2018_v39 = vadd.f32 %v2932_v5, %v2017_v16 }
 0x8bd   : > { %v2249_v42 = vsel %vm2246_vm5, %v2248_v0, %v2244_v3  ;;  %v1943_v15 = vsel %vm1942_vm9, %v2930_v59, %v1939_v10  ;;  %vm2383_vm9 = vcmask 1041408   ;;  %v2819_v3 = vld [vmem:[%s3784_s17 + $0x98] sm:$0xff] }
 0x8be   : > { %2363 = vperm.xlu0 %2867, %v2249_v42   ;;  %v1948_v18 = vsel %vm1945_vm10, %v1947_v17, %v1943_v15  ;;  %v2022_v21 = vsel %vm2021_vm1, %v2932_v5, %v2018_v39  ;;  %vm2446_vm10 = vcmask 1042432   ;;  %2491 = vmatpush.msrb.mxu3 %v2819_v3 }
 0x8bf   : > { %v2027_v25 = vsel %vm2024_vm12, %v2026_v22, %v2022_v21 }
 0x8c6   : > { %2868 = vset.pattern.permute.xlu0 %v2962_v8 }
 0x8c7   : > { %2387 = vperm.xlu0 %2868, %v2945_v9  }
 0x8cf   : > { %2562 = vrot.lane.b32.xlu0 %v1948_v18, %s2963_s2 }
 0x8d7   : > { %2566 = vrot.lane.b32.xlu0 %v2027_v25, %s2964_s8  ;;  %s2968_s8 = smov 8  }
 0x8df   : > { %2569 = vrot.lane.b32.xlu0 %v2249_v42, %s2965_s4  ;;  %s3842_s4 = smov 96   ;;  %v2818_v42 = vld [vmem:[%s3784_s17 + $0x90] sm:$0xff] }
 0x8e0   : > { %2492 = vmatpush.msrb.mxu3 %v2818_v42 }
 0x909   : > { %v2339_v23 = vpop.f32.mrf.mxu2 }
 0x90a   : > { %v2340_v31 = vadd.f32 %v2810_v29, %v2339_v23 }
 0x90c   : > { %v2342_v32 = vsub.f32 0.0, %v2340_v31 }
 0x90e   : > { %v2343_v33 = vmul.f32 1.442695, %v2342_v32 }
 0x910   : > { %2933 = vpow2.f32 %v2343_v33 }
 0x916   : > { %v2934_v34 = vpop.eup %2933 }
 0x917   : > { %v2345_v37 = vadd.f32 1.0, %v2934_v34 }
 0x919   : > { %2935 = vrcp.f32 %v2345_v37  ;;  %v2357_v62 = vand.u32 2147483648, %v2345_v37  ;;  %v2355_v46 = vand.u32 2147483647, %v2345_v37  ;;  %vm2351_vm4 = vweird.f32 %v2345_v37 }
 0x91b   : > { %v2358_v47 = vor.u32 1.1754944e-38, %v2357_v62  ;;  %vm2356_vm7 = vcmp.eq.f32.partialorder %v2355_v46, 8.507059e+37  ;;  %v2824_v46 = vld [vmem:[%s3787_s20 + $0x4] sm:$0x1] }
 0x91f   : > { %v2936_v40 = vpop.eup %2935 }
 0x920   : > { %v2347_v44 = vmul.f32 %v2936_v40, %v2345_v37  ;;  %vm2352_vm13 = vweird.f32 %v2936_v40  ;;  %v2823_v37 = vld [vmem:[%s3786_s19 + $0x48] sm:$0xff] }
 0x921   : > { %vm2353_vm5 = vmor %vm2351_vm4, %vm2352_vm13  ;;  %vm2442_vm4 = vcmask 23552  }
 0x922   : > { %v2348_v27 = vsub.f32 1.0, %v2347_v44  ;;  %v2820_v44 = vld [vmem:[%s3785_s18 + $0x4] sm:$0x1] }
 0x924   : > { %v2349_v45 = vmul.f32 %v2936_v40, %v2348_v27 }
 0x926   : > { %v2350_v36 = vadd.f32 %v2936_v40, %v2349_v45 }
 0x928   : > { %v2354_v48 = vsel %vm2353_vm5, %v2936_v40, %v2350_v36  ;;  %v2822_v40 = vld [vmem:[%s3786_s19 + $0x40] sm:$0xff] }
 0x929   : > { %v2359_v49 = vsel %vm2356_vm7, %v2358_v47, %v2354_v48  ;;  %vm2585_vm7 = vcmask 15360  }
 0x92a   : > { %2369 = vperm.xlu1 %2866, %v2359_v49   ;;  %2572 = vrot.lane.b32.xlu0 %v2359_v49, %s2966_s7 }
 0x930   : > { %v2364_v41 = vpop.permute.xlu0 %2363 }
 0x931   : > { %v2366_v52 = vmul.f32 %v2364_v41, %v3473_v38 }
 0x932   : > { %2576 = vrot.lane.b32.xlu0 %v2086_v43, %s2967_s6 }
 0x933   : > { %v2374_v54 = vrot.slane %v2366_v52, 7 }
 0x935   : > { %v2382_v11 = vsel %vm2381_vm8, %v3466_v26, %v2374_v54  ;;  %vm2588_vm8 = vcmask 31744  }
 0x939   : > { %v2388_v53 = vpop.permute.xlu0 %2387 }
 0x93a   : > { %2580 = vrot.lane.b32.xlu0 %v2145_v51, %s2968_s8  ;;  %v2390_v56 = vperm.slane %v2388_v53, 0 }
 0x941   : > { %v2563_v17 = vpop.permute.xlu0 %2562 }
 0x949   : > { %v2567_v18 = vpop.permute.xlu0 %2566 }
 0x951   : > { %v2570_v39 = vpop.permute.xlu0 %2569 }
 0x99c   : > { %v2370_v2 = vpop.permute.xlu1 %2369  ;;  %v2573_v20 = vpop.permute.xlu0 %2572 }
 0x99d   : > { %v2372_v35 = vmul.f32 %v2370_v2, %v3473_v38 }
 0x99f   : > { %v2377_v30 = vrot.slane %v2372_v35, 6  ;;  %2554 = vrot.lane.b32.xlu0 %v2372_v35, %s3841_s3 }
 0x9a1   : > { %2378 = vrot.lane.b32.xlu2 %v2377_v30, %s3842_s4  ;;  %s912_s4 = scalar_lea.vmem %s3795_s28, %s3845_s5 }
 0x9a4   : > { %v2577_v21 = vpop.permute.xlu0 %2576 }
 0x9ac   : > { %v2581_v22 = vpop.permute.xlu0 %2580 }
 0x9fb   : > { %v2379_v28 = vpop.permute.xlu2 %2378 }
 0x9fc   : > { %v2384_v55 = vsel %vm2383_vm9, %v2382_v11, %v2379_v28  ;;  %vm2590_vm9 = vcmask 39936  }
 0x9fd   : > { %2812 = vmatpush.xpose.msk.msrb.mxu0 %vm928_vm0, %v2384_v55  ;;  %2814 = vmatpush.msk.msra.mxu1 %vm2446_vm10, %v2384_v55  ;;  %vm2593_vm10 = vcmask 89088  }
 0xa00   : > { %2813 = vmatmul.msk.f32.vlgmr.msrb.gmra.mxu0 %vm928_vm0, %v2385_v58 }
 0xa01   : > { %2522 = vmatpush.msra.mxu0 %v2823_v37 }
 0xa03   : > { %2523 = vmatpush.msra.mxu0 %v2822_v40 }
 0xa11   : > { %v2555_v32 = vpop.permute.xlu0 %2554 }
 0xa7d   : > { %v2414_v38 = vpop.f32.mrf.mxu0 }
 0xa7e   : > { %v2415_v57 = vadd.f32 %v2414_v38, %v2390_v56 }
 0xa80   : > { %v2418_v59 = vsel %vm2417_vm2, %v2415_v57, -inf }
 0xa81   : > { %2419 = vmax.xlane.f32.xlu1 %v2418_v59 }
 0xa9a   : > { %2548 = vrot.lane.b32.xlu1 %v3466_v26, %s3840_s30  ;;  %v2817_v26 = vld [vmem:[%s3784_s17 + $0x88] sm:$0xff] }
 0xa9b   : > { %2493 = vmatpush.msrb.mxu3 %v2817_v26 }
 0xa9d   : > { %2494 = vmatpush.msrb.mxu3 %v2816_v19 }
 0xaf4   : > { %v2420_v60 = vpop.xlane.xlu1 %2419 }
 0xaf5   : > { %v2421_v61 = vsub.f32 %v2415_v57, %v2420_v60 }
 0xaf7   : > { %v2422_v63 = vmul.f32 1.442695, %v2421_v61 }
 0xaf9   : > { %2937 = vpow2.f32 %v2422_v63 }
 0xaff   : > { %v2938_v0 = vpop.eup %2937 }
 0xb00   : > { %v2424_v1 = vsel %vm2417_vm2, %v2938_v0, 0.0 }
 0xb01   : > { %2425 = vadd.xlane.f32.xlu2 %v2424_v1 }
 0xb0c   : > { %v2549_v25 = vpop.permute.xlu1 %2548 }
 0xb19   : > { %2551 = vrot.lane.b32.xlu2 %v2366_v52, %s3841_s3 }
 0xb74   : > { %v2426_v4 = vpop.xlane.xlu2 %2425 }
 0xb75   : > { %2939 = vrcp.f32 %v2426_v4  ;;  %v2438_v8 = vand.u32 2147483648, %v2426_v4  ;;  %v2436_v10 = vand.u32 2147483647, %v2426_v4  ;;  %vm2432_vm1 = vweird.f32 %v2426_v4 }
 0xb77   : > { %v2439_v13 = vor.u32 1.1754944e-38, %v2438_v8  ;;  %vm2437_vm13 = vcmp.eq.f32.partialorder %v2436_v10, 8.507059e+37 }
 0xb7b   : > { %v2940_v5 = vpop.eup %2939 }
 0xb7c   : > { %v2428_v6 = vmul.f32 %v2940_v5, %v2426_v4  ;;  %vm2433_vm11 = vweird.f32 %v2940_v5  ;;  %v2552_v23 = vpop.permute.xlu2 %2551 }
 0xb7d   : > { %vm2434_vm12 = vmor %vm2432_vm1, %vm2433_vm11 }
 0xb7e   : > { %v2429_v7 = vsub.f32 1.0, %v2428_v6 }
 0xb80   : > { %v2430_v9 = vmul.f32 %v2940_v5, %v2429_v7 }
 0xb82   : > { %v2431_v12 = vadd.f32 %v2940_v5, %v2430_v9 }
 0xb84   : > { %v2435_v14 = vsel %vm2434_vm12, %v2940_v5, %v2431_v12 }
 0xb85   : > { %v2440_v15 = vsel %vm2437_vm13, %v2439_v13, %v2435_v14 }
 0xb86   : > { %v2441_v16 = vmul.f32 %v2938_v0, %v2440_v15 }
 0xb88   : > { %2815 = vmatmul.msk.f32.vlgmr.msra.gmra.mxu1 %vm2442_vm4, %v2441_v16 }
 0xc05   : > { %v2466_v29 = vpop.f32.mrf.mxu1 }
 0xc06   : > { %v2557_v31 = vsel %vm928_vm0, %v2466_v29, %v2549_v25  ;;  %2821 = vmatmul.msk.f32.vlgmr.msrb.gmra.mxu3 %vm928_vm0, %v2466_v29 }
 0xc07   : > { %v2558_v33 = vsel %vm1600_vm14, %v2557_v31, %v2552_v23 }
 0xc08   : > { %v2559_v34 = vsel %vm1602_vm15, %v2558_v33, %v2555_v32  ;;  %vm2583_vm15 = vcmask 7168  }
 0xc09   : > { %2560 = vst [vmem:[%s909_s9] sm:$0x1] %v2559_v34 }
 0xc89   : > { %v2496_v27 = vpop.f32.mrf.mxu3 }
 0xc8a   : > { %v2497_v62 = vadd.f32 %v2820_v44, %v2496_v27 }
 0xc8c   : > { %v2499_v45 = vmax.f32 %v2497_v62, 0.0 }
 0xc8e   : > { %2825 = vmatmul.msk.f32.vlgmr.msra.gmra.mxu0 %vm1164_vm3, %v2499_v45 }
 0xd0b   : > { %v2525_v36 = vpop.f32.mrf.mxu0 }
 0xd0c   : > { %v2526_v47 = vadd.f32 %v2824_v46, %v2525_v36 }
 0xd0e   : > { %v2528_v48 = vsub.f32 0.0, %v2526_v47 }
 0xd10   : > { %v2529_v49 = vmul.f32 1.442695, %v2528_v48 }
 0xd12   : > { %2941 = vpow2.f32 %v2529_v49 }
 0xd18   : > { %v2942_v24 = vpop.eup %2941 }
 0xd19   : > { %v2531_v43 = vadd.f32 1.0, %v2942_v24 }
 0xd1b   : > { %2943 = vrcp.f32 %v2531_v43  ;;  %v2543_v35 = vand.u32 2147483648, %v2531_v43  ;;  %v2541_v41 = vand.u32 2147483647, %v2531_v43  ;;  %vm2537_vm3 = vweird.f32 %v2531_v43 }
 0xd1d   : > { %v2544_v54 = vor.u32 1.1754944e-38, %v2543_v35  ;;  %vm2542_vm5 = vcmp.eq.f32.partialorder %v2541_v41, 8.507059e+37 }
 0xd21   : > { %v2944_v50 = vpop.eup %2943 }
 0xd22   : > { %v2533_v51 = vmul.f32 %v2944_v50, %v2531_v43  ;;  %vm2538_vm0 = vweird.f32 %v2944_v50 }
 0xd23   : > { %vm2539_vm14 = vmor %vm2537_vm3, %vm2538_vm0 }
 0xd24   : > { %v2534_v2 = vsub.f32 1.0, %v2533_v51 }
 0xd26   : > { %v2535_v30 = vmul.f32 %v2944_v50, %v2534_v2 }
 0xd28   : > { %v2536_v52 = vadd.f32 %v2944_v50, %v2535_v30 }
 0xd2a   : > { %v2540_v28 = vsel %vm2539_vm14, %v2944_v50, %v2536_v52 }
 0xd2b   : > { %v2545_v11 = vsel %vm2542_vm5, %v2544_v54, %v2540_v28 }
 0xd2c   : > { %v2584_v55 = vsel %vm2583_vm15, %v2545_v11, %v2563_v17 }
 0xd2d   : > { %v2586_v58 = vsel %vm2585_vm7, %v2584_v55, %v2567_v18 }
 0xd2e   : > { %v2587_v53 = vsel %vm2442_vm4, %v2586_v58, %v2570_v39 }
 0xd2f   : > { %v2589_v56 = vsel %vm2588_vm8, %v2587_v53, %v2573_v20 }
 0xd30   : > { %v2591_v38 = vsel %vm2590_vm9, %v2589_v56, %v2577_v21 }
 0xd31   : > { %v2592_v57 = vsel %vm1368_vm6, %v2591_v38, %v2581_v22 }
 0xd32   : > { %v2594_v59 = vsel %vm2593_vm10, %v2592_v57, 0.0 }
 0xd33   : > { %2595 = vst [vmem:[%s912_s4] sm:$0x1] %v2594_v59 }
 0xd34 PF: > { %s3843_s9 = sld [smem:[#allocation2_spill]] }
 0xd3a   : > { %s39_s8 = sadd.s32 1, %s3843_s9  }
 0xd3b   : > { %p36_p4 = scmp.ge.s32.totalorder %s39_s8, 4  }
 0xd3d   :  { %38 = sbr.rel (!%p36_p4) target bundleno = 14 (0xe), region = 206 }

</bundles_post_ra>
